<compile_context>
chip_gen: v5e
topology: v5e:2x2
jax: 0.10.0
libtpu: 0.0.40
codegen_flags: <defaults>
</compile_context>

<pallas_src>
import numpy as np
import jax
import jax.numpy as jnp
from jax import lax
from jax.experimental import pallas as pl
from jax.experimental.pallas import tpu as pltpu

SEG = 441        # sum_seg_size = 44100 // 100 = 21*21
SEG_PAD = 512    # lane-dense padding of the 441-sample segment (multiple of 128)
K = 21           # conv kernel / stride
C_INT = 16       # c_int_sum
C_SUM = 64       # c_sum


# ----------------------------------------------------------------------------
# Pallas kernel: whole forward pass (encode + decode_train) in one invocation.
# ----------------------------------------------------------------------------
def conv_seq2seq_kernel(
    tf_ref,                                           # SMEM (T_next,) f32 teacher-forcing mask
    prev_ref, next_ref,                               # VMEM (T_prev*B,512) bf16, (T_next*B,512) bf16
    wsum_ref, bsum_ref,                               # fused conv1∘conv2: (512,64) bf16, (1,64) f32
    ewih0_ref, ewhh0_ref, eb0_ref,                    # encoder layer-0 (reordered i,f,o,g)
    ewih1_ref, ewhh1_ref, eb1_ref,                    # encoder layer-1
    dwih0_ref, dwhh0_ref, db0_ref,                    # decoder layer-0
    dwih1_ref, dwhh1_ref, db1_ref,                    # decoder layer-1
    wfbg_ref, bfbg_ref,                               # fused feedback: h1 -> decoder L0 gate input
    wout_ref, bout_ref,                               # fused fc∘deconv1∘deconv2: (H,512) bf16, (1,512) f32
    preds_ref,                                        # VMEM out (T_next, B, 512) f32
):
    H = dwhh0_ref.shape[0]
    t_next, B, _ = preds_ref.shape
    t_prev = prev_ref.shape[0] // B
    f32 = jnp.float32

    def dot(a, b):
        return jnp.dot(a, b, preferred_element_type=f32)

    def gates(g, c):
        # packed gate order is (i, f, o, g): one sigmoid pass over [0,3H),
        # one tanh pass over [3H,4H) — no redundant EUP work.
        sg = jax.nn.sigmoid(g[:, :3 * H])
        tg = jnp.tanh(g[:, 3 * H:])
        c_n = sg[:, H:2 * H] * c + sg[:, :H] * tg
        h_n = sg[:, 2 * H:3 * H] * jnp.tanh(c_n)
        return h_n, c_n

    # ---- batched, off the serial path: summarize + layer-0 input projections ----
    xenc = dot(prev_ref[...], wsum_ref[...]) + bsum_ref[...]        # (Tp*B, 64)
    xencp = dot(xenc, ewih0_ref[...]) + eb0_ref[...]                # (Tp*B, 4H)
    xnext = dot(next_ref[...], wsum_ref[...]) + bsum_ref[...]       # (Tn*B, 64)
    xnextp = dot(xnext, dwih0_ref[...]) + db0_ref[...]              # (Tn*B, 4H)

    h0 = jnp.zeros((B, H), f32)
    c0 = jnp.zeros((B, H), f32)
    h1 = jnp.zeros((B, H), f32)
    c1 = jnp.zeros((B, H), f32)

    # ---------------- encoder ----------------
    for t in range(t_prev):
        g0 = xencp[t * B:(t + 1) * B] + dot(h0, ewhh0_ref[...])
        h0, c0 = gates(g0, c0)
        g1 = dot(h0, ewih1_ref[...]) + dot(h1, ewhh1_ref[...]) + eb1_ref[...]
        h1, c1 = gates(g1, c1)

    # decoder step-0 input = summarize(last prev segment) through decoder L0 input map
    g0_in = dot(xenc[(t_prev - 1) * B:t_prev * B], dwih0_ref[...]) + db0_ref[...]

    # ---------------- decoder (decode_train) ----------------
    for t in range(t_next):
        g0 = g0_in + dot(h0, dwhh0_ref[...])
        h0, c0 = gates(g0, c0)
        g1 = dot(h0, dwih1_ref[...]) + dot(h1, dwhh1_ref[...]) + db1_ref[...]
        h1, c1 = gates(g1, c1)

        # fused fc -> deconv1 -> deconv2: one (H,512) matmul, lane-dense store.
        # Nothing downstream in the recurrence depends on it -> overlaps step t+1.
        preds_ref[t] = dot(h1.astype(jnp.bfloat16), wout_ref[...]) + bout_ref[...]

        # next-step input: teacher-forced steps use the precomputed projection of
        # summarize(next[t]); otherwise the pack-time-fused feedback
        #   summarize(pred) @ Wih0_dec + b0_dec == h1 @ W_fbg + b_fbg   (K = H only)
        fb = dot(h1, wfbg_ref[...]) + bfbg_ref[...]
        m_tf = tf_ref[t]                                    # 0.0 / 1.0 scalar (SMEM)
        g0_in = m_tf * xnextp[t * B:(t + 1) * B] + (1.0 - m_tf) * fb


# ----------------------------------------------------------------------------
# Parameter initialization (deterministic, PyTorch-shaped).
# ----------------------------------------------------------------------------
def init_params(key, hidden):
    ks = jax.random.split(key, 16)

    def u(k, shape, fan_in):
        b = 1.0 / np.sqrt(fan_in)
        return jax.random.uniform(k, shape, jnp.float32, -b, b)

    def lstm(k, in_sz, H):
        kk = jax.random.split(k, 8)
        return dict(
            wih0=u(kk[0], (4 * H, in_sz), H), whh0=u(kk[1], (4 * H, H), H),
            bih0=u(kk[2], (4 * H,), H), bhh0=u(kk[3], (4 * H,), H),
            wih1=u(kk[4], (4 * H, H), H), whh1=u(kk[5], (4 * H, H), H),
            bih1=u(kk[6], (4 * H,), H), bhh1=u(kk[7], (4 * H,), H),
        )

    return dict(
        conv1_w=u(ks[0], (C_INT, 1, K), 1 * K), conv1_b=u(ks[1], (C_INT,), 1 * K),
        conv2_w=u(ks[2], (C_SUM, C_INT, K), C_INT * K), conv2_b=u(ks[3], (C_SUM,), C_INT * K),
        enc=lstm(ks[4], C_SUM, hidden),
        dec=lstm(ks[5], C_SUM, hidden),
        fc_w=u(ks[6], (C_SUM, hidden), hidden), fc_b=u(ks[7], (C_SUM,), hidden),
        deconv1_w=u(ks[8], (C_SUM, C_INT, K), C_SUM * K), deconv1_b=u(ks[9], (C_INT,), C_SUM * K),
        deconv2_w=u(ks[10], (C_INT, 1, K), C_INT * K), deconv2_b=u(ks[11], (1,), C_INT * K),
    )


# ----------------------------------------------------------------------------
# Packing: PyTorch conv/deconv/lstm params -> matmul matrices.
# ----------------------------------------------------------------------------
def _block_diag_rep(a, n):
    """block_diag of n copies of `a` == kron(I_n, a)."""
    return jnp.kron(jnp.eye(n, dtype=a.dtype), a)


def _packed_mats(p):
    """Unfused packed matrices (same math as the verified v1/v2 kernels)."""
    # conv1: out[b,ci,t] = sum_k w1[ci,0,k]*x[b,t*21+k] + b1[ci]
    w1t = p['conv1_w'][:, 0, :].T                                    # (21, 16)
    w1big = _block_diag_rep(w1t, K)                                  # (441, 336)
    b1t = jnp.tile(p['conv1_b'], K)[None, :]                         # (1, 336)
    # conv2: out[b,co] = sum_{ci,t} w2[co,ci,t]*y[b,ci,t] + b2[co]
    w2p = jnp.transpose(p['conv2_w'], (2, 1, 0)).reshape(C_INT * K, C_SUM)
    b2 = p['conv2_b'][None, :]
    # deconv1 / deconv2
    wd1p = jnp.transpose(p['deconv1_w'], (0, 2, 1)).reshape(C_SUM, K * C_INT)
    bd1t = jnp.tile(p['deconv1_b'], K)[None, :]
    wd2big = _block_diag_rep(p['deconv2_w'][:, 0, :], K)             # (336, 441)
    bd2 = p['deconv2_b']                                             # (1,)

    def lstm(d, pre):
        return {pre + 'wih0': d['wih0'].T, pre + 'whh0': d['whh0'].T,
                pre + 'b0': (d['bih0'] + d['bhh0'])[None, :],
                pre + 'wih1': d['wih1'].T, pre + 'whh1': d['whh1'].T,
                pre + 'b1': (d['bih1'] + d['bhh1'])[None, :]}

    out = dict(w1big=w1big, b1t=b1t, w2p=w2p, b2=b2,
               wfc=p['fc_w'].T, bfc=p['fc_b'][None, :],
               wd1p=wd1p, bd1t=bd1t, wd2big=wd2big, bd2=bd2)
    out.update(lstm(p['enc'], 'e'))
    out.update(lstm(p['dec'], 'd'))
    return out


def pack_params(p):
    """Fuse the affine chains, reorder gates to (i,f,o,g), pad / cast for the kernel."""
    m = _packed_mats(p)
    H = p['fc_w'].shape[1]

    def reorder(w):  # columns (i,f,g,o) -> (i,f,o,g): tanh gate is the trailing block
        return jnp.concatenate([w[:, :2 * H], w[:, 3 * H:4 * H], w[:, 2 * H:3 * H]], axis=1)

    # conv1∘conv2 -> one (441,64) map, padded to (512,64) with zero rows.
    w_sum = m['w1big'] @ m['w2p']                                    # (441, 64) f32
    b_sum = m['b1t'] @ m['w2p'] + m['b2']                            # (1, 64)  f32
    w_sum_p = (jnp.zeros((SEG_PAD, C_SUM), jnp.float32)
               .at[:SEG, :].set(w_sum).astype(jnp.bfloat16))

    # fc∘deconv1∘deconv2 -> one (H,441) map, padded to (H,512)/(1,512) with zeros.
    w_out = m['wfc'] @ m['wd1p'] @ m['wd2big']                       # (H, 441) f32
    b_out = (m['bfc'] @ m['wd1p'] + m['bd1t']) @ m['wd2big'] + m['bd2'][0]  # (1, 441)
    w_out_p = (jnp.zeros((H, SEG_PAD), jnp.float32)
               .at[:, :SEG].set(w_out).astype(jnp.bfloat16))
    b_out_p = jnp.zeros((1, SEG_PAD), jnp.float32).at[:, :SEG].set(b_out)

    def lstm_pack(pre):
        return (reorder(m[pre + 'wih0']), reorder(m[pre + 'whh0']), reorder(m[pre + 'b0']),
                reorder(m[pre + 'wih1']), reorder(m[pre + 'whh1']), reorder(m[pre + 'b1']))

    e = lstm_pack('e')
    d = lstm_pack('d')
    d_wih0, _, d_b0 = d[0], d[1], d[2]

    # Fused non-forced feedback: summarize(pred) @ Wih0_dec + b0_dec, expressed from h1:
    #   pred = h1 @ w_out + b_out  ->  W_fbg = w_out @ w_sum @ Wih0_dec (H, 4H).
    w_fb = w_out @ w_sum                                             # (H, 64)
    b_fb = b_out @ w_sum + b_sum                                     # (1, 64)
    w_fbg = w_fb @ d_wih0                                            # (H, 4H)
    b_fbg = b_fb @ d_wih0 + d_b0                                     # (1, 4H)

    return [w_sum_p, b_sum, *e, *d, w_fbg, b_fbg, w_out_p, b_out_p]


# ----------------------------------------------------------------------------
# Wrapper
# ----------------------------------------------------------------------------
def conv_seq2seq_prev_feed(params, prev, nxt, tf_mask):
    B, Lp = prev.shape
    _, Ln = nxt.shape
    t_prev, t_next = Lp // SEG, Ln // SEG

    # time-major flat (T*B, 441), pad lane dim to 512 (zeros hit zero weight rows),
    # cast to bf16 for the K=512 summarize matmul (f32 accumulation in-kernel).
    prev_tm = jnp.transpose(prev.reshape(B, t_prev, SEG), (1, 0, 2)).reshape(t_prev * B, SEG)
    next_tm = jnp.transpose(nxt.reshape(B, t_next, SEG), (1, 0, 2)).reshape(t_next * B, SEG)
    prev_flat = jnp.pad(prev_tm.astype(jnp.float32),
                        ((0, 0), (0, SEG_PAD - SEG))).astype(jnp.bfloat16)
    next_flat = jnp.pad(next_tm.astype(jnp.float32),
                        ((0, 0), (0, SEG_PAD - SEG))).astype(jnp.bfloat16)

    weights = pack_params(params)

    vmem = pl.BlockSpec(memory_space=pltpu.MemorySpace.VMEM)
    smem = pl.BlockSpec(memory_space=pltpu.MemorySpace.SMEM)
    in_specs = [smem, vmem, vmem] + [vmem] * len(weights)

    preds_tm = pl.pallas_call(
        conv_seq2seq_kernel,
        out_shape=jax.ShapeDtypeStruct((t_next, B, SEG_PAD), jnp.float32),
        in_specs=in_specs,
        out_specs=vmem,
        compiler_params=pltpu.CompilerParams(vmem_limit_bytes=32 * 1024 * 1024),
    )(tf_mask.astype(jnp.float32), prev_flat, next_flat, *weights)

    # drop lane padding; matches stack(preds).permute(1,0,2).reshape(next.shape)
    preds = preds_tm[:, :, :SEG]
    return jnp.transpose(preds, (1, 0, 2)).reshape(B, t_next * SEG)


# ----------------------------------------------------------------------------
# Pure-JAX reference (UNFUSED packed math, highest precision) for sanity check.
# ----------------------------------------------------------------------------
def reference_forward(params, prev, nxt, tf_mask, hidden):
    m = _packed_mats(params)
    H = hidden
    dot = lambda a, b: jnp.dot(a, b, precision=lax.Precision.HIGHEST)

    def summarize(seg):
        return dot(dot(seg, m['w1big']) + m['b1t'], m['w2p']) + m['b2']

    def desummarize(h):
        return dot(dot(h, m['wd1p']) + m['bd1t'], m['wd2big']) + m['bd2'][0]

    def cell(x, h, c, wih, whh, b):
        g = dot(x, wih) + dot(h, whh) + b
        i = jax.nn.sigmoid(g[:, :H]); f = jax.nn.sigmoid(g[:, H:2 * H])
        gg = jnp.tanh(g[:, 2 * H:3 * H]); o = jax.nn.sigmoid(g[:, 3 * H:])
        c = f * c + i * gg
        return o * jnp.tanh(c), c

    B, Lp = prev.shape
    t_prev, t_next = Lp // SEG, nxt.shape[1] // SEG
    prev_tm = jnp.transpose(prev.reshape(B, t_prev, SEG), (1, 0, 2))
    next_tm = jnp.transpose(nxt.reshape(B, t_next, SEG), (1, 0, 2))

    h0 = c0 = h1 = c1 = jnp.zeros((B, H), jnp.float32)
    for t in range(t_prev):
        x = summarize(prev_tm[t])
        h0, c0 = cell(x, h0, c0, m['ewih0'], m['ewhh0'], m['eb0'])
        h1, c1 = cell(h0, h1, c1, m['ewih1'], m['ewhh1'], m['eb1'])
    x_in = summarize(prev_tm[-1])
    preds = []
    for t in range(t_next):
        h0, c0 = cell(x_in, h0, c0, m['dwih0'], m['dwhh0'], m['db0'])
        h1, c1 = cell(h0, h1, c1, m['dwih1'], m['dwhh1'], m['db1'])
        fc_out = dot(h1, m['wfc']) + m['bfc']
        pred = desummarize(fc_out)
        preds.append(pred)
        mm = (tf_mask[t] == 1).astype(jnp.float32)
        x_in = summarize(mm * next_tm[t] + (1.0 - mm) * pred)
    preds = jnp.stack(preds)  # (T, B, 441)
    return jnp.transpose(preds, (1, 0, 2)).reshape(B, t_next * SEG)


# ----------------------------------------------------------------------------
if __name__ == "__main__":
    hidden = 32
    B = 2
    T_PREV = 3     # prev length = 3 * 441 = 1323 samples
    T_NEXT = 3     # next length = 3 * 441 = 1323 samples

    key = jax.random.PRNGKey(0)
    k_param, k_prev, k_next = jax.random.split(key, 3)

    params = init_params(k_param, hidden)
    prev = 0.1 * jax.random.normal(k_prev, (B, T_PREV * SEG), jnp.float32)
    nxt = 0.1 * jax.random.normal(k_next, (B, T_NEXT * SEG), jnp.float32)
    # deterministic stand-in for `random.random() < teacher_forcing_ratio`,
    # chosen so both the teacher-forced and the feedback branch are exercised.
    tf_mask = jnp.array([1, 0, 1], dtype=jnp.int32)

    out = conv_seq2seq_prev_feed(params, prev, nxt, tf_mask)
    out = jax.block_until_ready(out)
    assert out.shape == (B, T_NEXT * SEG), out.shape

    ref = reference_forward(params, prev, nxt, tf_mask, hidden)
    max_err = float(jnp.max(jnp.abs(out - ref)))
    assert max_err < 5e-2, f"max abs error vs reference too large: {max_err}"

    print("KERNEL_OK")
</pallas_src>

<mosaic_0001>
module attributes {stable_mosaic.version = 11 : i64} {
  func.func @conv_seq2seq_kernel(%arg0: memref<3xf32, #tpu.memory_space<smem>>, %arg1: memref<6x512xbf16, #tpu.memory_space<vmem>>, %arg2: memref<6x512xbf16, #tpu.memory_space<vmem>>, %arg3: memref<512x64xbf16, #tpu.memory_space<vmem>>, %arg4: memref<1x64xf32, #tpu.memory_space<vmem>>, %arg5: memref<64x128xf32, #tpu.memory_space<vmem>>, %arg6: memref<32x128xf32, #tpu.memory_space<vmem>>, %arg7: memref<1x128xf32, #tpu.memory_space<vmem>>, %arg8: memref<32x128xf32, #tpu.memory_space<vmem>>, %arg9: memref<32x128xf32, #tpu.memory_space<vmem>>, %arg10: memref<1x128xf32, #tpu.memory_space<vmem>>, %arg11: memref<64x128xf32, #tpu.memory_space<vmem>>, %arg12: memref<32x128xf32, #tpu.memory_space<vmem>>, %arg13: memref<1x128xf32, #tpu.memory_space<vmem>>, %arg14: memref<32x128xf32, #tpu.memory_space<vmem>>, %arg15: memref<32x128xf32, #tpu.memory_space<vmem>>, %arg16: memref<1x128xf32, #tpu.memory_space<vmem>>, %arg17: memref<32x128xf32, #tpu.memory_space<vmem>>, %arg18: memref<1x128xf32, #tpu.memory_space<vmem>>, %arg19: memref<32x512xbf16, #tpu.memory_space<vmem>>, %arg20: memref<1x512xf32, #tpu.memory_space<vmem>>, %arg21: memref<3x2x512xf32, #tpu.memory_space<vmem>>) attributes {dimension_semantics = [], scalar_prefetch = 0 : i64, scratch_operands = 0 : i64, tpu.core_type = #tpu.core_type<tc>} {
    %c0 = arith.constant 0 : index
    %c0_0 = arith.constant 0 : index
    %0 = vector.load %arg1[%c0, %c0_0] : memref<6x512xbf16, #tpu.memory_space<vmem>>, vector<6x512xbf16>
    %c0_1 = arith.constant 0 : index
    %c0_2 = arith.constant 0 : index
    %1 = vector.load %arg3[%c0_1, %c0_2] : memref<512x64xbf16, #tpu.memory_space<vmem>>, vector<512x64xbf16>
    %cst = arith.constant dense<0.000000e+00> : vector<6x64xf32>
    %2 = tpu.matmul %0, %1, %cst {dimension_numbers = #tpu.dot_dimension_numbers<[1], [0], [0], [1], [0, 0, 1, 1], [], []>} : vector<6x512xbf16>, vector<512x64xbf16>, vector<6x64xf32> -> vector<6x64xf32>
    %c0_3 = arith.constant 0 : index
    %c0_4 = arith.constant 0 : index
    %3 = vector.load %arg4[%c0_3, %c0_4] : memref<1x64xf32, #tpu.memory_space<vmem>>, vector<1x64xf32>
    %4 = vector.broadcast %3 : vector<1x64xf32> to vector<6x64xf32>
    %5 = arith.addf %2, %4 : vector<6x64xf32>
    %c0_5 = arith.constant 0 : index
    %c0_6 = arith.constant 0 : index
    %6 = vector.load %arg5[%c0_5, %c0_6] : memref<64x128xf32, #tpu.memory_space<vmem>>, vector<64x128xf32>
    %cst_7 = arith.constant dense<0.000000e+00> : vector<6x128xf32>
    %7 = tpu.matmul %5, %6, %cst_7 {dimension_numbers = #tpu.dot_dimension_numbers<[1], [0], [0], [1], [0, 0, 1, 1], [], []>} : vector<6x64xf32>, vector<64x128xf32>, vector<6x128xf32> -> vector<6x128xf32>
    %c0_8 = arith.constant 0 : index
    %c0_9 = arith.constant 0 : index
    %8 = vector.load %arg7[%c0_8, %c0_9] : memref<1x128xf32, #tpu.memory_space<vmem>>, vector<1x128xf32>
    %9 = vector.broadcast %8 : vector<1x128xf32> to vector<6x128xf32>
    %10 = arith.addf %7, %9 : vector<6x128xf32>
    %c0_10 = arith.constant 0 : index
    %c0_11 = arith.constant 0 : index
    %11 = vector.load %arg2[%c0_10, %c0_11] : memref<6x512xbf16, #tpu.memory_space<vmem>>, vector<6x512xbf16>
    %c0_12 = arith.constant 0 : index
    %c0_13 = arith.constant 0 : index
    %12 = vector.load %arg3[%c0_12, %c0_13] : memref<512x64xbf16, #tpu.memory_space<vmem>>, vector<512x64xbf16>
    %cst_14 = arith.constant dense<0.000000e+00> : vector<6x64xf32>
    %13 = tpu.matmul %11, %12, %cst_14 {dimension_numbers = #tpu.dot_dimension_numbers<[1], [0], [0], [1], [0, 0, 1, 1], [], []>} : vector<6x512xbf16>, vector<512x64xbf16>, vector<6x64xf32> -> vector<6x64xf32>
    %c0_15 = arith.constant 0 : index
    %c0_16 = arith.constant 0 : index
    %14 = vector.load %arg4[%c0_15, %c0_16] : memref<1x64xf32, #tpu.memory_space<vmem>>, vector<1x64xf32>
    %15 = vector.broadcast %14 : vector<1x64xf32> to vector<6x64xf32>
    %16 = arith.addf %13, %15 : vector<6x64xf32>
    %c0_17 = arith.constant 0 : index
    %c0_18 = arith.constant 0 : index
    %17 = vector.load %arg11[%c0_17, %c0_18] : memref<64x128xf32, #tpu.memory_space<vmem>>, vector<64x128xf32>
    %cst_19 = arith.constant dense<0.000000e+00> : vector<6x128xf32>
    %18 = tpu.matmul %16, %17, %cst_19 {dimension_numbers = #tpu.dot_dimension_numbers<[1], [0], [0], [1], [0, 0, 1, 1], [], []>} : vector<6x64xf32>, vector<64x128xf32>, vector<6x128xf32> -> vector<6x128xf32>
    %c0_20 = arith.constant 0 : index
    %c0_21 = arith.constant 0 : index
    %19 = vector.load %arg13[%c0_20, %c0_21] : memref<1x128xf32, #tpu.memory_space<vmem>>, vector<1x128xf32>
    %20 = vector.broadcast %19 : vector<1x128xf32> to vector<6x128xf32>
    %21 = arith.addf %18, %20 : vector<6x128xf32>
    %cst_22 = arith.constant 0.000000e+00 : f32
    %22 = vector.broadcast %cst_22 : f32 to vector<2x32xf32>
    %cst_23 = arith.constant 0.000000e+00 : f32
    %23 = vector.broadcast %cst_23 : f32 to vector<2x32xf32>
    %cst_24 = arith.constant 0.000000e+00 : f32
    %24 = vector.broadcast %cst_24 : f32 to vector<2x32xf32>
    %cst_25 = arith.constant 0.000000e+00 : f32
    %25 = vector.broadcast %cst_25 : f32 to vector<2x32xf32>
    %26 = vector.extract_strided_slice %10 {offsets = [0, 0], sizes = [2, 128], strides = [1, 1]} : vector<6x128xf32> to vector<2x128xf32>
    %c0_26 = arith.constant 0 : index
    %c0_27 = arith.constant 0 : index
    %27 = vector.load %arg6[%c0_26, %c0_27] : memref<32x128xf32, #tpu.memory_space<vmem>>, vector<32x128xf32>
    %cst_28 = arith.constant dense<0.000000e+00> : vector<2x128xf32>
    %28 = tpu.matmul %22, %27, %cst_28 {dimension_numbers = #tpu.dot_dimension_numbers<[1], [0], [0], [1], [0, 0, 1, 1], [], []>} : vector<2x32xf32>, vector<32x128xf32>, vector<2x128xf32> -> vector<2x128xf32>
    %29 = arith.addf %26, %28 : vector<2x128xf32>
    %30 = vector.extract_strided_slice %29 {offsets = [0, 0], sizes = [2, 96], strides = [1, 1]} : vector<2x128xf32> to vector<2x96xf32>
    %31 = arith.negf %30 : vector<2x96xf32>
    %32 = math.exp %31 : vector<2x96xf32>
    %cst_29 = arith.constant 1.000000e+00 : f32
    %33 = vector.broadcast %cst_29 : f32 to vector<2x96xf32>
    %34 = arith.addf %33, %32 : vector<2x96xf32>
    %35 = arith.divf %33, %34 : vector<2x96xf32>
    %36 = vector.extract_strided_slice %29 {offsets = [0, 96], sizes = [2, 32], strides = [1, 1]} : vector<2x128xf32> to vector<2x32xf32>
    %37 = math.tanh %36 : vector<2x32xf32>
    %38 = vector.extract_strided_slice %35 {offsets = [0, 32], sizes = [2, 32], strides = [1, 1]} : vector<2x96xf32> to vector<2x32xf32>
    %39 = arith.mulf %38, %23 : vector<2x32xf32>
    %40 = vector.extract_strided_slice %35 {offsets = [0, 0], sizes = [2, 32], strides = [1, 1]} : vector<2x96xf32> to vector<2x32xf32>
    %41 = arith.mulf %40, %37 : vector<2x32xf32>
    %42 = arith.addf %39, %41 : vector<2x32xf32>
    %43 = vector.extract_strided_slice %35 {offsets = [0, 64], sizes = [2, 32], strides = [1, 1]} : vector<2x96xf32> to vector<2x32xf32>
    %44 = math.tanh %42 : vector<2x32xf32>
    %45 = arith.mulf %43, %44 : vector<2x32xf32>
    %c0_30 = arith.constant 0 : index
    %c0_31 = arith.constant 0 : index
    %46 = vector.load %arg8[%c0_30, %c0_31] : memref<32x128xf32, #tpu.memory_space<vmem>>, vector<32x128xf32>
    %cst_32 = arith.constant dense<0.000000e+00> : vector<2x128xf32>
    %47 = tpu.matmul %45, %46, %cst_32 {dimension_numbers = #tpu.dot_dimension_numbers<[1], [0], [0], [1], [0, 0, 1, 1], [], []>} : vector<2x32xf32>, vector<32x128xf32>, vector<2x128xf32> -> vector<2x128xf32>
    %c0_33 = arith.constant 0 : index
    %c0_34 = arith.constant 0 : index
    %48 = vector.load %arg9[%c0_33, %c0_34] : memref<32x128xf32, #tpu.memory_space<vmem>>, vector<32x128xf32>
    %cst_35 = arith.constant dense<0.000000e+00> : vector<2x128xf32>
    %49 = tpu.matmul %24, %48, %cst_35 {dimension_numbers = #tpu.dot_dimension_numbers<[1], [0], [0], [1], [0, 0, 1, 1], [], []>} : vector<2x32xf32>, vector<32x128xf32>, vector<2x128xf32> -> vector<2x128xf32>
    %50 = arith.addf %47, %49 : vector<2x128xf32>
    %c0_36 = arith.constant 0 : index
    %c0_37 = arith.constant 0 : index
    %51 = vector.load %arg10[%c0_36, %c0_37] : memref<1x128xf32, #tpu.memory_space<vmem>>, vector<1x128xf32>
    %52 = vector.broadcast %51 : vector<1x128xf32> to vector<2x128xf32>
    %53 = arith.addf %50, %52 : vector<2x128xf32>
    %54 = vector.extract_strided_slice %53 {offsets = [0, 0], sizes = [2, 96], strides = [1, 1]} : vector<2x128xf32> to vector<2x96xf32>
    %55 = arith.negf %54 : vector<2x96xf32>
    %56 = math.exp %55 : vector<2x96xf32>
    %cst_38 = arith.constant 1.000000e+00 : f32
    %57 = vector.broadcast %cst_38 : f32 to vector<2x96xf32>
    %58 = arith.addf %57, %56 : vector<2x96xf32>
    %59 = arith.divf %57, %58 : vector<2x96xf32>
    %60 = vector.extract_strided_slice %53 {offsets = [0, 96], sizes = [2, 32], strides = [1, 1]} : vector<2x128xf32> to vector<2x32xf32>
    %61 = math.tanh %60 : vector<2x32xf32>
    %62 = vector.extract_strided_slice %59 {offsets = [0, 32], sizes = [2, 32], strides = [1, 1]} : vector<2x96xf32> to vector<2x32xf32>
    %63 = arith.mulf %62, %25 : vector<2x32xf32>
    %64 = vector.extract_strided_slice %59 {offsets = [0, 0], sizes = [2, 32], strides = [1, 1]} : vector<2x96xf32> to vector<2x32xf32>
    %65 = arith.mulf %64, %61 : vector<2x32xf32>
    %66 = arith.addf %63, %65 : vector<2x32xf32>
    %67 = vector.extract_strided_slice %59 {offsets = [0, 64], sizes = [2, 32], strides = [1, 1]} : vector<2x96xf32> to vector<2x32xf32>
    %68 = math.tanh %66 : vector<2x32xf32>
    %69 = arith.mulf %67, %68 : vector<2x32xf32>
    %70 = vector.extract_strided_slice %10 {offsets = [2, 0], sizes = [2, 128], strides = [1, 1]} : vector<6x128xf32> to vector<2x128xf32>
    %c0_39 = arith.constant 0 : index
    %c0_40 = arith.constant 0 : index
    %71 = vector.load %arg6[%c0_39, %c0_40] : memref<32x128xf32, #tpu.memory_space<vmem>>, vector<32x128xf32>
    %cst_41 = arith.constant dense<0.000000e+00> : vector<2x128xf32>
    %72 = tpu.matmul %45, %71, %cst_41 {dimension_numbers = #tpu.dot_dimension_numbers<[1], [0], [0], [1], [0, 0, 1, 1], [], []>} : vector<2x32xf32>, vector<32x128xf32>, vector<2x128xf32> -> vector<2x128xf32>
    %73 = arith.addf %70, %72 : vector<2x128xf32>
    %74 = vector.extract_strided_slice %73 {offsets = [0, 0], sizes = [2, 96], strides = [1, 1]} : vector<2x128xf32> to vector<2x96xf32>
    %75 = arith.negf %74 : vector<2x96xf32>
    %76 = math.exp %75 : vector<2x96xf32>
    %cst_42 = arith.constant 1.000000e+00 : f32
    %77 = vector.broadcast %cst_42 : f32 to vector<2x96xf32>
    %78 = arith.addf %77, %76 : vector<2x96xf32>
    %79 = arith.divf %77, %78 : vector<2x96xf32>
    %80 = vector.extract_strided_slice %73 {offsets = [0, 96], sizes = [2, 32], strides = [1, 1]} : vector<2x128xf32> to vector<2x32xf32>
    %81 = math.tanh %80 : vector<2x32xf32>
    %82 = vector.extract_strided_slice %79 {offsets = [0, 32], sizes = [2, 32], strides = [1, 1]} : vector<2x96xf32> to vector<2x32xf32>
    %83 = arith.mulf %82, %42 : vector<2x32xf32>
    %84 = vector.extract_strided_slice %79 {offsets = [0, 0], sizes = [2, 32], strides = [1, 1]} : vector<2x96xf32> to vector<2x32xf32>
    %85 = arith.mulf %84, %81 : vector<2x32xf32>
    %86 = arith.addf %83, %85 : vector<2x32xf32>
    %87 = vector.extract_strided_slice %79 {offsets = [0, 64], sizes = [2, 32], strides = [1, 1]} : vector<2x96xf32> to vector<2x32xf32>
    %88 = math.tanh %86 : vector<2x32xf32>
    %89 = arith.mulf %87, %88 : vector<2x32xf32>
    %c0_43 = arith.constant 0 : index
    %c0_44 = arith.constant 0 : index
    %90 = vector.load %arg8[%c0_43, %c0_44] : memref<32x128xf32, #tpu.memory_space<vmem>>, vector<32x128xf32>
    %cst_45 = arith.constant dense<0.000000e+00> : vector<2x128xf32>
    %91 = tpu.matmul %89, %90, %cst_45 {dimension_numbers = #tpu.dot_dimension_numbers<[1], [0], [0], [1], [0, 0, 1, 1], [], []>} : vector<2x32xf32>, vector<32x128xf32>, vector<2x128xf32> -> vector<2x128xf32>
    %c0_46 = arith.constant 0 : index
    %c0_47 = arith.constant 0 : index
    %92 = vector.load %arg9[%c0_46, %c0_47] : memref<32x128xf32, #tpu.memory_space<vmem>>, vector<32x128xf32>
    %cst_48 = arith.constant dense<0.000000e+00> : vector<2x128xf32>
    %93 = tpu.matmul %69, %92, %cst_48 {dimension_numbers = #tpu.dot_dimension_numbers<[1], [0], [0], [1], [0, 0, 1, 1], [], []>} : vector<2x32xf32>, vector<32x128xf32>, vector<2x128xf32> -> vector<2x128xf32>
    %94 = arith.addf %91, %93 : vector<2x128xf32>
    %c0_49 = arith.constant 0 : index
    %c0_50 = arith.constant 0 : index
    %95 = vector.load %arg10[%c0_49, %c0_50] : memref<1x128xf32, #tpu.memory_space<vmem>>, vector<1x128xf32>
    %96 = vector.broadcast %95 : vector<1x128xf32> to vector<2x128xf32>
    %97 = arith.addf %94, %96 : vector<2x128xf32>
    %98 = vector.extract_strided_slice %97 {offsets = [0, 0], sizes = [2, 96], strides = [1, 1]} : vector<2x128xf32> to vector<2x96xf32>
    %99 = arith.negf %98 : vector<2x96xf32>
    %100 = math.exp %99 : vector<2x96xf32>
    %cst_51 = arith.constant 1.000000e+00 : f32
    %101 = vector.broadcast %cst_51 : f32 to vector<2x96xf32>
    %102 = arith.addf %101, %100 : vector<2x96xf32>
    %103 = arith.divf %101, %102 : vector<2x96xf32>
    %104 = vector.extract_strided_slice %97 {offsets = [0, 96], sizes = [2, 32], strides = [1, 1]} : vector<2x128xf32> to vector<2x32xf32>
    %105 = math.tanh %104 : vector<2x32xf32>
    %106 = vector.extract_strided_slice %103 {offsets = [0, 32], sizes = [2, 32], strides = [1, 1]} : vector<2x96xf32> to vector<2x32xf32>
    %107 = arith.mulf %106, %66 : vector<2x32xf32>
    %108 = vector.extract_strided_slice %103 {offsets = [0, 0], sizes = [2, 32], strides = [1, 1]} : vector<2x96xf32> to vector<2x32xf32>
    %109 = arith.mulf %108, %105 : vector<2x32xf32>
    %110 = arith.addf %107, %109 : vector<2x32xf32>
    %111 = vector.extract_strided_slice %103 {offsets = [0, 64], sizes = [2, 32], strides = [1, 1]} : vector<2x96xf32> to vector<2x32xf32>
    %112 = math.tanh %110 : vector<2x32xf32>
    %113 = arith.mulf %111, %112 : vector<2x32xf32>
    %114 = vector.extract_strided_slice %10 {offsets = [4, 0], sizes = [2, 128], strides = [1, 1]} : vector<6x128xf32> to vector<2x128xf32>
    %c0_52 = arith.constant 0 : index
    %c0_53 = arith.constant 0 : index
    %115 = vector.load %arg6[%c0_52, %c0_53] : memref<32x128xf32, #tpu.memory_space<vmem>>, vector<32x128xf32>
    %cst_54 = arith.constant dense<0.000000e+00> : vector<2x128xf32>
    %116 = tpu.matmul %89, %115, %cst_54 {dimension_numbers = #tpu.dot_dimension_numbers<[1], [0], [0], [1], [0, 0, 1, 1], [], []>} : vector<2x32xf32>, vector<32x128xf32>, vector<2x128xf32> -> vector<2x128xf32>
    %117 = arith.addf %114, %116 : vector<2x128xf32>
    %118 = vector.extract_strided_slice %117 {offsets = [0, 0], sizes = [2, 96], strides = [1, 1]} : vector<2x128xf32> to vector<2x96xf32>
    %119 = arith.negf %118 : vector<2x96xf32>
    %120 = math.exp %119 : vector<2x96xf32>
    %cst_55 = arith.constant 1.000000e+00 : f32
    %121 = vector.broadcast %cst_55 : f32 to vector<2x96xf32>
    %122 = arith.addf %121, %120 : vector<2x96xf32>
    %123 = arith.divf %121, %122 : vector<2x96xf32>
    %124 = vector.extract_strided_slice %117 {offsets = [0, 96], sizes = [2, 32], strides = [1, 1]} : vector<2x128xf32> to vector<2x32xf32>
    %125 = math.tanh %124 : vector<2x32xf32>
    %126 = vector.extract_strided_slice %123 {offsets = [0, 32], sizes = [2, 32], strides = [1, 1]} : vector<2x96xf32> to vector<2x32xf32>
    %127 = arith.mulf %126, %86 : vector<2x32xf32>
    %128 = vector.extract_strided_slice %123 {offsets = [0, 0], sizes = [2, 32], strides = [1, 1]} : vector<2x96xf32> to vector<2x32xf32>
    %129 = arith.mulf %128, %125 : vector<2x32xf32>
    %130 = arith.addf %127, %129 : vector<2x32xf32>
    %131 = vector.extract_strided_slice %123 {offsets = [0, 64], sizes = [2, 32], strides = [1, 1]} : vector<2x96xf32> to vector<2x32xf32>
    %132 = math.tanh %130 : vector<2x32xf32>
    %133 = arith.mulf %131, %132 : vector<2x32xf32>
    %c0_56 = arith.constant 0 : index
    %c0_57 = arith.constant 0 : index
    %134 = vector.load %arg8[%c0_56, %c0_57] : memref<32x128xf32, #tpu.memory_space<vmem>>, vector<32x128xf32>
    %cst_58 = arith.constant dense<0.000000e+00> : vector<2x128xf32>
    %135 = tpu.matmul %133, %134, %cst_58 {dimension_numbers = #tpu.dot_dimension_numbers<[1], [0], [0], [1], [0, 0, 1, 1], [], []>} : vector<2x32xf32>, vector<32x128xf32>, vector<2x128xf32> -> vector<2x128xf32>
    %c0_59 = arith.constant 0 : index
    %c0_60 = arith.constant 0 : index
    %136 = vector.load %arg9[%c0_59, %c0_60] : memref<32x128xf32, #tpu.memory_space<vmem>>, vector<32x128xf32>
    %cst_61 = arith.constant dense<0.000000e+00> : vector<2x128xf32>
    %137 = tpu.matmul %113, %136, %cst_61 {dimension_numbers = #tpu.dot_dimension_numbers<[1], [0], [0], [1], [0, 0, 1, 1], [], []>} : vector<2x32xf32>, vector<32x128xf32>, vector<2x128xf32> -> vector<2x128xf32>
    %138 = arith.addf %135, %137 : vector<2x128xf32>
    %c0_62 = arith.constant 0 : index
    %c0_63 = arith.constant 0 : index
    %139 = vector.load %arg10[%c0_62, %c0_63] : memref<1x128xf32, #tpu.memory_space<vmem>>, vector<1x128xf32>
    %140 = vector.broadcast %139 : vector<1x128xf32> to vector<2x128xf32>
    %141 = arith.addf %138, %140 : vector<2x128xf32>
    %142 = vector.extract_strided_slice %141 {offsets = [0, 0], sizes = [2, 96], strides = [1, 1]} : vector<2x128xf32> to vector<2x96xf32>
    %143 = arith.negf %142 : vector<2x96xf32>
    %144 = math.exp %143 : vector<2x96xf32>
    %cst_64 = arith.constant 1.000000e+00 : f32
    %145 = vector.broadcast %cst_64 : f32 to vector<2x96xf32>
    %146 = arith.addf %145, %144 : vector<2x96xf32>
    %147 = arith.divf %145, %146 : vector<2x96xf32>
    %148 = vector.extract_strided_slice %141 {offsets = [0, 96], sizes = [2, 32], strides = [1, 1]} : vector<2x128xf32> to vector<2x32xf32>
    %149 = math.tanh %148 : vector<2x32xf32>
    %150 = vector.extract_strided_slice %147 {offsets = [0, 32], sizes = [2, 32], strides = [1, 1]} : vector<2x96xf32> to vector<2x32xf32>
    %151 = arith.mulf %150, %110 : vector<2x32xf32>
    %152 = vector.extract_strided_slice %147 {offsets = [0, 0], sizes = [2, 32], strides = [1, 1]} : vector<2x96xf32> to vector<2x32xf32>
    %153 = arith.mulf %152, %149 : vector<2x32xf32>
    %154 = arith.addf %151, %153 : vector<2x32xf32>
    %155 = vector.extract_strided_slice %147 {offsets = [0, 64], sizes = [2, 32], strides = [1, 1]} : vector<2x96xf32> to vector<2x32xf32>
    %156 = math.tanh %154 : vector<2x32xf32>
    %157 = arith.mulf %155, %156 : vector<2x32xf32>
    %158 = vector.extract_strided_slice %5 {offsets = [4, 0], sizes = [2, 64], strides = [1, 1]} : vector<6x64xf32> to vector<2x64xf32>
    %c0_65 = arith.constant 0 : index
    %c0_66 = arith.constant 0 : index
    %159 = vector.load %arg11[%c0_65, %c0_66] : memref<64x128xf32, #tpu.memory_space<vmem>>, vector<64x128xf32>
    %cst_67 = arith.constant dense<0.000000e+00> : vector<2x128xf32>
    %160 = tpu.matmul %158, %159, %cst_67 {dimension_numbers = #tpu.dot_dimension_numbers<[1], [0], [0], [1], [0, 0, 1, 1], [], []>} : vector<2x64xf32>, vector<64x128xf32>, vector<2x128xf32> -> vector<2x128xf32>
    %c0_68 = arith.constant 0 : index
    %c0_69 = arith.constant 0 : index
    %161 = vector.load %arg13[%c0_68, %c0_69] : memref<1x128xf32, #tpu.memory_space<vmem>>, vector<1x128xf32>
    %162 = vector.broadcast %161 : vector<1x128xf32> to vector<2x128xf32>
    %163 = arith.addf %160, %162 : vector<2x128xf32>
    %c0_70 = arith.constant 0 : index
    %c0_71 = arith.constant 0 : index
    %164 = vector.load %arg12[%c0_70, %c0_71] : memref<32x128xf32, #tpu.memory_space<vmem>>, vector<32x128xf32>
    %cst_72 = arith.constant dense<0.000000e+00> : vector<2x128xf32>
    %165 = tpu.matmul %133, %164, %cst_72 {dimension_numbers = #tpu.dot_dimension_numbers<[1], [0], [0], [1], [0, 0, 1, 1], [], []>} : vector<2x32xf32>, vector<32x128xf32>, vector<2x128xf32> -> vector<2x128xf32>
    %166 = arith.addf %163, %165 : vector<2x128xf32>
    %167 = vector.extract_strided_slice %166 {offsets = [0, 0], sizes = [2, 96], strides = [1, 1]} : vector<2x128xf32> to vector<2x96xf32>
    %168 = arith.negf %167 : vector<2x96xf32>
    %169 = math.exp %168 : vector<2x96xf32>
    %cst_73 = arith.constant 1.000000e+00 : f32
    %170 = vector.broadcast %cst_73 : f32 to vector<2x96xf32>
    %171 = arith.addf %170, %169 : vector<2x96xf32>
    %172 = arith.divf %170, %171 : vector<2x96xf32>
    %173 = vector.extract_strided_slice %166 {offsets = [0, 96], sizes = [2, 32], strides = [1, 1]} : vector<2x128xf32> to vector<2x32xf32>
    %174 = math.tanh %173 : vector<2x32xf32>
    %175 = vector.extract_strided_slice %172 {offsets = [0, 32], sizes = [2, 32], strides = [1, 1]} : vector<2x96xf32> to vector<2x32xf32>
    %176 = arith.mulf %175, %130 : vector<2x32xf32>
    %177 = vector.extract_strided_slice %172 {offsets = [0, 0], sizes = [2, 32], strides = [1, 1]} : vector<2x96xf32> to vector<2x32xf32>
    %178 = arith.mulf %177, %174 : vector<2x32xf32>
    %179 = arith.addf %176, %178 : vector<2x32xf32>
    %180 = vector.extract_strided_slice %172 {offsets = [0, 64], sizes = [2, 32], strides = [1, 1]} : vector<2x96xf32> to vector<2x32xf32>
    %181 = math.tanh %179 : vector<2x32xf32>
    %182 = arith.mulf %180, %181 : vector<2x32xf32>
    %c0_74 = arith.constant 0 : index
    %c0_75 = arith.constant 0 : index
    %183 = vector.load %arg14[%c0_74, %c0_75] : memref<32x128xf32, #tpu.memory_space<vmem>>, vector<32x128xf32>
    %cst_76 = arith.constant dense<0.000000e+00> : vector<2x128xf32>
    %184 = tpu.matmul %182, %183, %cst_76 {dimension_numbers = #tpu.dot_dimension_numbers<[1], [0], [0], [1], [0, 0, 1, 1], [], []>} : vector<2x32xf32>, vector<32x128xf32>, vector<2x128xf32> -> vector<2x128xf32>
    %c0_77 = arith.constant 0 : index
    %c0_78 = arith.constant 0 : index
    %185 = vector.load %arg15[%c0_77, %c0_78] : memref<32x128xf32, #tpu.memory_space<vmem>>, vector<32x128xf32>
    %cst_79 = arith.constant dense<0.000000e+00> : vector<2x128xf32>
    %186 = tpu.matmul %157, %185, %cst_79 {dimension_numbers = #tpu.dot_dimension_numbers<[1], [0], [0], [1], [0, 0, 1, 1], [], []>} : vector<2x32xf32>, vector<32x128xf32>, vector<2x128xf32> -> vector<2x128xf32>
    %187 = arith.addf %184, %186 : vector<2x128xf32>
    %c0_80 = arith.constant 0 : index
    %c0_81 = arith.constant 0 : index
    %188 = vector.load %arg16[%c0_80, %c0_81] : memref<1x128xf32, #tpu.memory_space<vmem>>, vector<1x128xf32>
    %189 = vector.broadcast %188 : vector<1x128xf32> to vector<2x128xf32>
    %190 = arith.addf %187, %189 : vector<2x128xf32>
    %191 = vector.extract_strided_slice %190 {offsets = [0, 0], sizes = [2, 96], strides = [1, 1]} : vector<2x128xf32> to vector<2x96xf32>
    %192 = arith.negf %191 : vector<2x96xf32>
    %193 = math.exp %192 : vector<2x96xf32>
    %cst_82 = arith.constant 1.000000e+00 : f32
    %194 = vector.broadcast %cst_82 : f32 to vector<2x96xf32>
    %195 = arith.addf %194, %193 : vector<2x96xf32>
    %196 = arith.divf %194, %195 : vector<2x96xf32>
    %197 = vector.extract_strided_slice %190 {offsets = [0, 96], sizes = [2, 32], strides = [1, 1]} : vector<2x128xf32> to vector<2x32xf32>
    %198 = math.tanh %197 : vector<2x32xf32>
    %199 = vector.extract_strided_slice %196 {offsets = [0, 32], sizes = [2, 32], strides = [1, 1]} : vector<2x96xf32> to vector<2x32xf32>
    %200 = arith.mulf %199, %154 : vector<2x32xf32>
    %201 = vector.extract_strided_slice %196 {offsets = [0, 0], sizes = [2, 32], strides = [1, 1]} : vector<2x96xf32> to vector<2x32xf32>
    %202 = arith.mulf %201, %198 : vector<2x32xf32>
    %203 = arith.addf %200, %202 : vector<2x32xf32>
    %204 = vector.extract_strided_slice %196 {offsets = [0, 64], sizes = [2, 32], strides = [1, 1]} : vector<2x96xf32> to vector<2x32xf32>
    %205 = math.tanh %203 : vector<2x32xf32>
    %206 = arith.mulf %204, %205 : vector<2x32xf32>
    %207 = arith.truncf %206 : vector<2x32xf32> to vector<2x32xbf16>
    %c0_83 = arith.constant 0 : index
    %c0_84 = arith.constant 0 : index
    %208 = vector.load %arg19[%c0_83, %c0_84] : memref<32x512xbf16, #tpu.memory_space<vmem>>, vector<32x512xbf16>
    %cst_85 = arith.constant dense<0.000000e+00> : vector<2x512xf32>
    %209 = tpu.matmul %207, %208, %cst_85 {dimension_numbers = #tpu.dot_dimension_numbers<[1], [0], [0], [1], [0, 0, 1, 1], [], []>} : vector<2x32xbf16>, vector<32x512xbf16>, vector<2x512xf32> -> vector<2x512xf32>
    %c0_86 = arith.constant 0 : index
    %c0_87 = arith.constant 0 : index
    %210 = vector.load %arg20[%c0_86, %c0_87] : memref<1x512xf32, #tpu.memory_space<vmem>>, vector<1x512xf32>
    %211 = vector.broadcast %210 : vector<1x512xf32> to vector<2x512xf32>
    %212 = arith.addf %209, %211 : vector<2x512xf32>
    %c0_88 = arith.constant 0 : index
    %c0_89 = arith.constant 0 : index
    %c0_90 = arith.constant 0 : index
    %213 = vector.load %arg21[%c0_88, %c0_89, %c0_90] : memref<3x2x512xf32, #tpu.memory_space<vmem>>, vector<1x2x512xf32>
    %214 = vector.shape_cast %213 : vector<1x2x512xf32> to vector<2x512xf32>
    %215 = vector.shape_cast %212 : vector<2x512xf32> to vector<1x2x512xf32>
    tpu.vector_store %arg21[%c0_88, %c0_89, %c0_90], %215 {strides = array<i32>} : memref<3x2x512xf32, #tpu.memory_space<vmem>>, vector<1x2x512xf32>,
    %c0_91 = arith.constant 0 : index
    %c0_92 = arith.constant 0 : index
    %216 = vector.load %arg17[%c0_91, %c0_92] : memref<32x128xf32, #tpu.memory_space<vmem>>, vector<32x128xf32>
    %cst_93 = arith.constant dense<0.000000e+00> : vector<2x128xf32>
    %217 = tpu.matmul %206, %216, %cst_93 {dimension_numbers = #tpu.dot_dimension_numbers<[1], [0], [0], [1], [0, 0, 1, 1], [], []>} : vector<2x32xf32>, vector<32x128xf32>, vector<2x128xf32> -> vector<2x128xf32>
    %c0_94 = arith.constant 0 : index
    %c0_95 = arith.constant 0 : index
    %218 = vector.load %arg18[%c0_94, %c0_95] : memref<1x128xf32, #tpu.memory_space<vmem>>, vector<1x128xf32>
    %219 = vector.broadcast %218 : vector<1x128xf32> to vector<2x128xf32>
    %220 = arith.addf %217, %219 : vector<2x128xf32>
    %c0_96 = arith.constant 0 : index
    %221 = memref.load %arg0[%c0_96] : memref<3xf32, #tpu.memory_space<smem>>
    %222 = vector.extract_strided_slice %21 {offsets = [0, 0], sizes = [2, 128], strides = [1, 1]} : vector<6x128xf32> to vector<2x128xf32>
    %223 = vector.broadcast %221 : f32 to vector<2x128xf32>
    %224 = arith.mulf %223, %222 : vector<2x128xf32>
    %cst_97 = arith.constant 1.000000e+00 : f32
    %225 = arith.subf %cst_97, %221 : f32
    %226 = vector.broadcast %225 : f32 to vector<2x128xf32>
    %227 = arith.mulf %226, %220 : vector<2x128xf32>
    %228 = arith.addf %224, %227 : vector<2x128xf32>
    %c0_98 = arith.constant 0 : index
    %c0_99 = arith.constant 0 : index
    %229 = vector.load %arg12[%c0_98, %c0_99] : memref<32x128xf32, #tpu.memory_space<vmem>>, vector<32x128xf32>
    %cst_100 = arith.constant dense<0.000000e+00> : vector<2x128xf32>
    %230 = tpu.matmul %182, %229, %cst_100 {dimension_numbers = #tpu.dot_dimension_numbers<[1], [0], [0], [1], [0, 0, 1, 1], [], []>} : vector<2x32xf32>, vector<32x128xf32>, vector<2x128xf32> -> vector<2x128xf32>
    %231 = arith.addf %228, %230 : vector<2x128xf32>
    %232 = vector.extract_strided_slice %231 {offsets = [0, 0], sizes = [2, 96], strides = [1, 1]} : vector<2x128xf32> to vector<2x96xf32>
    %233 = arith.negf %232 : vector<2x96xf32>
    %234 = math.exp %233 : vector<2x96xf32>
    %cst_101 = arith.constant 1.000000e+00 : f32
    %235 = vector.broadcast %cst_101 : f32 to vector<2x96xf32>
    %236 = arith.addf %235, %234 : vector<2x96xf32>
    %237 = arith.divf %235, %236 : vector<2x96xf32>
    %238 = vector.extract_strided_slice %231 {offsets = [0, 96], sizes = [2, 32], strides = [1, 1]} : vector<2x128xf32> to vector<2x32xf32>
    %239 = math.tanh %238 : vector<2x32xf32>
    %240 = vector.extract_strided_slice %237 {offsets = [0, 32], sizes = [2, 32], strides = [1, 1]} : vector<2x96xf32> to vector<2x32xf32>
    %241 = arith.mulf %240, %179 : vector<2x32xf32>
    %242 = vector.extract_strided_slice %237 {offsets = [0, 0], sizes = [2, 32], strides = [1, 1]} : vector<2x96xf32> to vector<2x32xf32>
    %243 = arith.mulf %242, %239 : vector<2x32xf32>
    %244 = arith.addf %241, %243 : vector<2x32xf32>
    %245 = vector.extract_strided_slice %237 {offsets = [0, 64], sizes = [2, 32], strides = [1, 1]} : vector<2x96xf32> to vector<2x32xf32>
    %246 = math.tanh %244 : vector<2x32xf32>
    %247 = arith.mulf %245, %246 : vector<2x32xf32>
    %c0_102 = arith.constant 0 : index
    %c0_103 = arith.constant 0 : index
    %248 = vector.load %arg14[%c0_102, %c0_103] : memref<32x128xf32, #tpu.memory_space<vmem>>, vector<32x128xf32>
    %cst_104 = arith.constant dense<0.000000e+00> : vector<2x128xf32>
    %249 = tpu.matmul %247, %248, %cst_104 {dimension_numbers = #tpu.dot_dimension_numbers<[1], [0], [0], [1], [0, 0, 1, 1], [], []>} : vector<2x32xf32>, vector<32x128xf32>, vector<2x128xf32> -> vector<2x128xf32>
    %c0_105 = arith.constant 0 : index
    %c0_106 = arith.constant 0 : index
    %250 = vector.load %arg15[%c0_105, %c0_106] : memref<32x128xf32, #tpu.memory_space<vmem>>, vector<32x128xf32>
    %cst_107 = arith.constant dense<0.000000e+00> : vector<2x128xf32>
    %251 = tpu.matmul %206, %250, %cst_107 {dimension_numbers = #tpu.dot_dimension_numbers<[1], [0], [0], [1], [0, 0, 1, 1], [], []>} : vector<2x32xf32>, vector<32x128xf32>, vector<2x128xf32> -> vector<2x128xf32>
    %252 = arith.addf %249, %251 : vector<2x128xf32>
    %c0_108 = arith.constant 0 : index
    %c0_109 = arith.constant 0 : index
    %253 = vector.load %arg16[%c0_108, %c0_109] : memref<1x128xf32, #tpu.memory_space<vmem>>, vector<1x128xf32>
    %254 = vector.broadcast %253 : vector<1x128xf32> to vector<2x128xf32>
    %255 = arith.addf %252, %254 : vector<2x128xf32>
    %256 = vector.extract_strided_slice %255 {offsets = [0, 0], sizes = [2, 96], strides = [1, 1]} : vector<2x128xf32> to vector<2x96xf32>
    %257 = arith.negf %256 : vector<2x96xf32>
    %258 = math.exp %257 : vector<2x96xf32>
    %cst_110 = arith.constant 1.000000e+00 : f32
    %259 = vector.broadcast %cst_110 : f32 to vector<2x96xf32>
    %260 = arith.addf %259, %258 : vector<2x96xf32>
    %261 = arith.divf %259, %260 : vector<2x96xf32>
    %262 = vector.extract_strided_slice %255 {offsets = [0, 96], sizes = [2, 32], strides = [1, 1]} : vector<2x128xf32> to vector<2x32xf32>
    %263 = math.tanh %262 : vector<2x32xf32>
    %264 = vector.extract_strided_slice %261 {offsets = [0, 32], sizes = [2, 32], strides = [1, 1]} : vector<2x96xf32> to vector<2x32xf32>
    %265 = arith.mulf %264, %203 : vector<2x32xf32>
    %266 = vector.extract_strided_slice %261 {offsets = [0, 0], sizes = [2, 32], strides = [1, 1]} : vector<2x96xf32> to vector<2x32xf32>
    %267 = arith.mulf %266, %263 : vector<2x32xf32>
    %268 = arith.addf %265, %267 : vector<2x32xf32>
    %269 = vector.extract_strided_slice %261 {offsets = [0, 64], sizes = [2, 32], strides = [1, 1]} : vector<2x96xf32> to vector<2x32xf32>
    %270 = math.tanh %268 : vector<2x32xf32>
    %271 = arith.mulf %269, %270 : vector<2x32xf32>
    %272 = arith.truncf %271 : vector<2x32xf32> to vector<2x32xbf16>
    %c0_111 = arith.constant 0 : index
    %c0_112 = arith.constant 0 : index
    %273 = vector.load %arg19[%c0_111, %c0_112] : memref<32x512xbf16, #tpu.memory_space<vmem>>, vector<32x512xbf16>
    %cst_113 = arith.constant dense<0.000000e+00> : vector<2x512xf32>
    %274 = tpu.matmul %272, %273, %cst_113 {dimension_numbers = #tpu.dot_dimension_numbers<[1], [0], [0], [1], [0, 0, 1, 1], [], []>} : vector<2x32xbf16>, vector<32x512xbf16>, vector<2x512xf32> -> vector<2x512xf32>
    %c0_114 = arith.constant 0 : index
    %c0_115 = arith.constant 0 : index
    %275 = vector.load %arg20[%c0_114, %c0_115] : memref<1x512xf32, #tpu.memory_space<vmem>>, vector<1x512xf32>
    %276 = vector.broadcast %275 : vector<1x512xf32> to vector<2x512xf32>
    %277 = arith.addf %274, %276 : vector<2x512xf32>
    %c1 = arith.constant 1 : index
    %c0_116 = arith.constant 0 : index
    %c0_117 = arith.constant 0 : index
    %278 = vector.load %arg21[%c1, %c0_116, %c0_117] : memref<3x2x512xf32, #tpu.memory_space<vmem>>, vector<1x2x512xf32>
    %279 = vector.shape_cast %278 : vector<1x2x512xf32> to vector<2x512xf32>
    %280 = vector.shape_cast %277 : vector<2x512xf32> to vector<1x2x512xf32>
    tpu.vector_store %arg21[%c1, %c0_116, %c0_117], %280 {strides = array<i32>} : memref<3x2x512xf32, #tpu.memory_space<vmem>>, vector<1x2x512xf32>,
    %c0_118 = arith.constant 0 : index
    %c0_119 = arith.constant 0 : index
    %281 = vector.load %arg17[%c0_118, %c0_119] : memref<32x128xf32, #tpu.memory_space<vmem>>, vector<32x128xf32>
    %cst_120 = arith.constant dense<0.000000e+00> : vector<2x128xf32>
    %282 = tpu.matmul %271, %281, %cst_120 {dimension_numbers = #tpu.dot_dimension_numbers<[1], [0], [0], [1], [0, 0, 1, 1], [], []>} : vector<2x32xf32>, vector<32x128xf32>, vector<2x128xf32> -> vector<2x128xf32>
    %c0_121 = arith.constant 0 : index
    %c0_122 = arith.constant 0 : index
    %283 = vector.load %arg18[%c0_121, %c0_122] : memref<1x128xf32, #tpu.memory_space<vmem>>, vector<1x128xf32>
    %284 = vector.broadcast %283 : vector<1x128xf32> to vector<2x128xf32>
    %285 = arith.addf %282, %284 : vector<2x128xf32>
    %c1_123 = arith.constant 1 : index
    %286 = memref.load %arg0[%c1_123] : memref<3xf32, #tpu.memory_space<smem>>
    %287 = vector.extract_strided_slice %21 {offsets = [2, 0], sizes = [2, 128], strides = [1, 1]} : vector<6x128xf32> to vector<2x128xf32>
    %288 = vector.broadcast %286 : f32 to vector<2x128xf32>
    %289 = arith.mulf %288, %287 : vector<2x128xf32>
    %cst_124 = arith.constant 1.000000e+00 : f32
    %290 = arith.subf %cst_124, %286 : f32
    %291 = vector.broadcast %290 : f32 to vector<2x128xf32>
    %292 = arith.mulf %291, %285 : vector<2x128xf32>
    %293 = arith.addf %289, %292 : vector<2x128xf32>
    %c0_125 = arith.constant 0 : index
    %c0_126 = arith.constant 0 : index
    %294 = vector.load %arg12[%c0_125, %c0_126] : memref<32x128xf32, #tpu.memory_space<vmem>>, vector<32x128xf32>
    %cst_127 = arith.constant dense<0.000000e+00> : vector<2x128xf32>
    %295 = tpu.matmul %247, %294, %cst_127 {dimension_numbers = #tpu.dot_dimension_numbers<[1], [0], [0], [1], [0, 0, 1, 1], [], []>} : vector<2x32xf32>, vector<32x128xf32>, vector<2x128xf32> -> vector<2x128xf32>
    %296 = arith.addf %293, %295 : vector<2x128xf32>
    %297 = vector.extract_strided_slice %296 {offsets = [0, 0], sizes = [2, 96], strides = [1, 1]} : vector<2x128xf32> to vector<2x96xf32>
    %298 = arith.negf %297 : vector<2x96xf32>
    %299 = math.exp %298 : vector<2x96xf32>
    %cst_128 = arith.constant 1.000000e+00 : f32
    %300 = vector.broadcast %cst_128 : f32 to vector<2x96xf32>
    %301 = arith.addf %300, %299 : vector<2x96xf32>
    %302 = arith.divf %300, %301 : vector<2x96xf32>
    %303 = vector.extract_strided_slice %296 {offsets = [0, 96], sizes = [2, 32], strides = [1, 1]} : vector<2x128xf32> to vector<2x32xf32>
    %304 = math.tanh %303 : vector<2x32xf32>
    %305 = vector.extract_strided_slice %302 {offsets = [0, 32], sizes = [2, 32], strides = [1, 1]} : vector<2x96xf32> to vector<2x32xf32>
    %306 = arith.mulf %305, %244 : vector<2x32xf32>
    %307 = vector.extract_strided_slice %302 {offsets = [0, 0], sizes = [2, 32], strides = [1, 1]} : vector<2x96xf32> to vector<2x32xf32>
    %308 = arith.mulf %307, %304 : vector<2x32xf32>
    %309 = arith.addf %306, %308 : vector<2x32xf32>
    %310 = vector.extract_strided_slice %302 {offsets = [0, 64], sizes = [2, 32], strides = [1, 1]} : vector<2x96xf32> to vector<2x32xf32>
    %311 = math.tanh %309 : vector<2x32xf32>
    %312 = arith.mulf %310, %311 : vector<2x32xf32>
    %c0_129 = arith.constant 0 : index
    %c0_130 = arith.constant 0 : index
    %313 = vector.load %arg14[%c0_129, %c0_130] : memref<32x128xf32, #tpu.memory_space<vmem>>, vector<32x128xf32>
    %cst_131 = arith.constant dense<0.000000e+00> : vector<2x128xf32>
    %314 = tpu.matmul %312, %313, %cst_131 {dimension_numbers = #tpu.dot_dimension_numbers<[1], [0], [0], [1], [0, 0, 1, 1], [], []>} : vector<2x32xf32>, vector<32x128xf32>, vector<2x128xf32> -> vector<2x128xf32>
    %c0_132 = arith.constant 0 : index
    %c0_133 = arith.constant 0 : index
    %315 = vector.load %arg15[%c0_132, %c0_133] : memref<32x128xf32, #tpu.memory_space<vmem>>, vector<32x128xf32>
    %cst_134 = arith.constant dense<0.000000e+00> : vector<2x128xf32>
    %316 = tpu.matmul %271, %315, %cst_134 {dimension_numbers = #tpu.dot_dimension_numbers<[1], [0], [0], [1], [0, 0, 1, 1], [], []>} : vector<2x32xf32>, vector<32x128xf32>, vector<2x128xf32> -> vector<2x128xf32>
    %317 = arith.addf %314, %316 : vector<2x128xf32>
    %c0_135 = arith.constant 0 : index
    %c0_136 = arith.constant 0 : index
    %318 = vector.load %arg16[%c0_135, %c0_136] : memref<1x128xf32, #tpu.memory_space<vmem>>, vector<1x128xf32>
    %319 = vector.broadcast %318 : vector<1x128xf32> to vector<2x128xf32>
    %320 = arith.addf %317, %319 : vector<2x128xf32>
    %321 = vector.extract_strided_slice %320 {offsets = [0, 0], sizes = [2, 96], strides = [1, 1]} : vector<2x128xf32> to vector<2x96xf32>
    %322 = arith.negf %321 : vector<2x96xf32>
    %323 = math.exp %322 : vector<2x96xf32>
    %cst_137 = arith.constant 1.000000e+00 : f32
    %324 = vector.broadcast %cst_137 : f32 to vector<2x96xf32>
    %325 = arith.addf %324, %323 : vector<2x96xf32>
    %326 = arith.divf %324, %325 : vector<2x96xf32>
    %327 = vector.extract_strided_slice %320 {offsets = [0, 96], sizes = [2, 32], strides = [1, 1]} : vector<2x128xf32> to vector<2x32xf32>
    %328 = math.tanh %327 : vector<2x32xf32>
    %329 = vector.extract_strided_slice %326 {offsets = [0, 32], sizes = [2, 32], strides = [1, 1]} : vector<2x96xf32> to vector<2x32xf32>
    %330 = arith.mulf %329, %268 : vector<2x32xf32>
    %331 = vector.extract_strided_slice %326 {offsets = [0, 0], sizes = [2, 32], strides = [1, 1]} : vector<2x96xf32> to vector<2x32xf32>
    %332 = arith.mulf %331, %328 : vector<2x32xf32>
    %333 = arith.addf %330, %332 : vector<2x32xf32>
    %334 = vector.extract_strided_slice %326 {offsets = [0, 64], sizes = [2, 32], strides = [1, 1]} : vector<2x96xf32> to vector<2x32xf32>
    %335 = math.tanh %333 : vector<2x32xf32>
    %336 = arith.mulf %334, %335 : vector<2x32xf32>
    %337 = arith.truncf %336 : vector<2x32xf32> to vector<2x32xbf16>
    %c0_138 = arith.constant 0 : index
    %c0_139 = arith.constant 0 : index
    %338 = vector.load %arg19[%c0_138, %c0_139] : memref<32x512xbf16, #tpu.memory_space<vmem>>, vector<32x512xbf16>
    %cst_140 = arith.constant dense<0.000000e+00> : vector<2x512xf32>
    %339 = tpu.matmul %337, %338, %cst_140 {dimension_numbers = #tpu.dot_dimension_numbers<[1], [0], [0], [1], [0, 0, 1, 1], [], []>} : vector<2x32xbf16>, vector<32x512xbf16>, vector<2x512xf32> -> vector<2x512xf32>
    %c0_141 = arith.constant 0 : index
    %c0_142 = arith.constant 0 : index
    %340 = vector.load %arg20[%c0_141, %c0_142] : memref<1x512xf32, #tpu.memory_space<vmem>>, vector<1x512xf32>
    %341 = vector.broadcast %340 : vector<1x512xf32> to vector<2x512xf32>
    %342 = arith.addf %339, %341 : vector<2x512xf32>
    %c2 = arith.constant 2 : index
    %c0_143 = arith.constant 0 : index
    %c0_144 = arith.constant 0 : index
    %343 = vector.load %arg21[%c2, %c0_143, %c0_144] : memref<3x2x512xf32, #tpu.memory_space<vmem>>, vector<1x2x512xf32>
    %344 = vector.shape_cast %343 : vector<1x2x512xf32> to vector<2x512xf32>
    %345 = vector.shape_cast %342 : vector<2x512xf32> to vector<1x2x512xf32>
    tpu.vector_store %arg21[%c2, %c0_143, %c0_144], %345 {strides = array<i32>} : memref<3x2x512xf32, #tpu.memory_space<vmem>>, vector<1x2x512xf32>,
    return
  }
}

</mosaic_0001>

<bundles_post_ra>
// kernel: tpu_custom_call.1
= control target key start
LH: loop header
LB: loop body
LE: loop exit
PB: predicated region body
PF: predicated region fallthrough
CT: control target
= control target key end

     0   :  { %s3656_s0 = inlined_call_operand.hbm [shape: f32[3], index: 0, kind: input, shape index: {}]   ;;  %s3657_s1 = inlined_call_operand.hbm [shape: bf16[6,512], index: 1, kind: input, shape index: {}]   ;;  %s3658_s2 = inlined_call_operand.hbm [shape: bf16[6,512], index: 2, kind: input, shape index: {}]   ;;  %s3659_s3 = inlined_call_operand.vmem [shape: bf16[512,64], index: 3, kind: input, shape index: {}]   ;;  %s3660_s4 = inlined_call_operand.hbm [shape: f32[1,64], index: 4, kind: input, shape index: {}]   ;;  %s3661_s5 = inlined_call_operand.vmem [shape: f32[64,128], index: 5, kind: input, shape index: {}]   ;;  %s3662_s6 = inlined_call_operand.vmem [shape: f32[32,128], index: 6, kind: input, shape index: {}]   ;;  %s3663_s7 = inlined_call_operand.hbm [shape: f32[1,128], index: 7, kind: input, shape index: {}]   ;;  %s3664_s8 = inlined_call_operand.vmem [shape: f32[32,128], index: 8, kind: input, shape index: {}]   ;;  %s3665_s9 = inlined_call_operand.vmem [shape: f32[32,128], index: 9, kind: input, shape index: {}]   ;;  %s3666_s10 = inlined_call_operand.vmem [shape: f32[1,128], index: 10, kind: input, shape index: {}]   ;;  %s3667_s11 = inlined_call_operand.vmem [shape: f32[64,128], index: 11, kind: input, shape index: {}]   ;;  %s3668_s12 = inlined_call_operand.vmem [shape: f32[32,128], index: 12, kind: input, shape index: {}]   ;;  %s3669_s13 = inlined_call_operand.vmem [shape: f32[1,128], index: 13, kind: input, shape index: {}]   ;;  %s3670_s14 = inlined_call_operand.vmem [shape: f32[32,128], index: 14, kind: input, shape index: {}]   ;;  %s3671_s15 = inlined_call_operand.vmem [shape: f32[32,128], index: 15, kind: input, shape index: {}]   ;;  %s3672_s16 = inlined_call_operand.vmem [shape: f32[1,128], index: 16, kind: input, shape index: {}]   ;;  %s3673_s17 = inlined_call_operand.hbm [shape: f32[32,128], index: 17, kind: input, shape index: {}]   ;;  %s3674_s18 = inlined_call_operand.vmem [shape: f32[1,128], index: 18, kind: input, shape index: {}]   ;;  %s3675_s19 = inlined_call_operand.vmem [shape: bf16[32,512], index: 19, kind: input, shape index: {}]   ;;  %s3676_s20 = inlined_call_operand.vmem [shape: f32[1,512], index: 20, kind: input, shape index: {}]   ;;  %s3677_s21 = inlined_call_operand.hbm [shape: f32[3,2,512], index: 21, kind: output, shape index: {}]  }
   0x1   :  { %3680 = sst [smem:[#allocation19_spill]] %s3656_s0 }
   0x2   :  { %3681 = sst [smem:[#allocation20_spill]] %s3657_s1 }
   0x3   :  { %3682 = sst [smem:[#allocation21_spill]] %s3658_s2 }
   0x4   :  { %3683 = sst [smem:[#allocation22_spill]] %s3659_s3 }
   0x5   :  { %3684 = sst [smem:[#allocation23_spill]] %s3660_s4 }
   0x6   :  { %3685 = sst [smem:[#allocation24_spill]] %s3661_s5 }
   0x7   :  { %3686 = sst [smem:[#allocation25_spill]] %s3677_s21 }
   0x8   :  { %26 = vsyncpa [#allocation5], 0 }
   0x9   :  { %27 = vsyncpa [#allocation3], 0 }
   0xa   :  { %28 = vsyncpa [#allocation8], 0 }
   0xb   :  { %29 = vsyncpa [#allocation11], 0  ;;  %s3687_s26 = sld [smem:[#allocation21_spill]] }
  0x11   :  { %s56_s27 = sshll.u32 %s3687_s26, 4  ;;  %s57_s27 = int_to_ptr.hbm [resolvable:$true] %s56_s27 }
  0x12   :  { %30 = vsyncpa [#allocation4], 0  ;;  %s2702_s3 = smov [#allocation7]   ;;  %s84_s4 = sshll.u32 %s3663_s7, 4  ;;  %s85_s4 = int_to_ptr.hbm [resolvable:$true] %s84_s4 }
  0x13   :  { %s58_s28 = sshll.u32 %s2702_s3, 4  ;;  %s2703_s30 = smov [#allocation10]   ;;  %s59_s28 = int_to_ptr.vmem [resolvable:$true] %s58_s28 }
  0x14   :  { %61 = dma.hbm_to_vmem [thread:$0]  %s57_s27, 256, %s59_s28, [#allocation8]  }
  0x15   :  { %s86_s5 = sshll.u32 %s2703_s30, 4  ;;  %s3688_s1 = sld [smem:[#allocation19_spill]]  ;;  %s87_s5 = int_to_ptr.vmem [resolvable:$true] %s86_s5 }
  0x16   :  { %89 = dma.hbm_to_vmem [thread:$0]  %s85_s4, 16, %s87_s5, [#allocation11]  }
  0x17   :  { %s3689_s26 = sld [smem:[#allocation20_spill]]  ;;  %s2704_s21 = smov [#allocation2]  }
  0x18   :  { %s2705_s29 = smov [#allocation6]   ;;  %s3690_s0 = sld [smem:[#allocation23_spill]] }
  0x19   :  { %s47_s7 = sshll.u32 %s2705_s29, 4  ;;  %s112_s4 = sshll.u32 %s3673_s17, 4  ;;  %s48_s7 = int_to_ptr.vmem [resolvable:$true] %s47_s7  ;;  %s113_s4 = int_to_ptr.hbm [resolvable:$true] %s112_s4 }
  0x1a   :  { %s2706_s5 = smov [#allocation9]   ;;  %s2708_s2 = smov 128  }
  0x1b   :  { %s36_s24 = sshll.u32 %s3688_s1, 4  ;;  %s71_s1 = sshll.u32 %s2706_s5, 4  ;;  %s37_s24 = int_to_ptr.hbm [resolvable:$true] %s36_s24  ;;  %s72_s1 = int_to_ptr.vmem [resolvable:$true] %s71_s1 }
  0x1c   :  { %39 = dma.hbm_to_smem %s37_s24, 16, %s2704_s21, [#allocation5]  }
  0x1d   :  { %s45_s3 = sshll.u32 %s3689_s26, 4  ;;  %s2707_s21 = smov [#allocation12]   ;;  %s46_s3 = int_to_ptr.hbm [resolvable:$true] %s45_s3 }
  0x1e   :  { %s69_s30 = sshll.u32 %s3690_s0, 4  ;;  %s114_s24 = sshll.u32 %s2707_s21, 4  ;;  %s70_s30 = int_to_ptr.hbm [resolvable:$true] %s69_s30  ;;  %s115_s24 = int_to_ptr.vmem [resolvable:$true] %s114_s24 }
  0x1f   :  { %50 = dma.hbm_to_vmem [thread:$0]  %s46_s3, 256, %s48_s7, [#allocation3]  }
  0x20   :  { %74 = dma.hbm_to_vmem [thread:$0]  %s70_s30, 16, %s72_s1, [#allocation8]  }
  0x21   :  { %s2709_s25 = smov 8  }
  0x22   :  { %120 = dma.hbm_to_vmem [thread:$0]  %s113_s4, 512, %s115_s24, [#allocation11], %s2708_s2, %s2708_s2, %s2709_s25  }
  0x23   :  { %2692 = dma.done.wait [#allocation5], 16  }
  0x24   :  { %2693 = vsyncadd [#allocation5], 4294967280 }
  0x25   :  { %2694 = dma.done.wait [#allocation3], 256  }
  0x26   :  { %2695 = vsyncadd [#allocation3], 4294967040 }
  0x27   :  { %2696 = dma.done.wait [#allocation8], 272  }
  0x28   :  { %2697 = vsyncadd [#allocation8], 4294967024 }
  0x29   :  { %2698 = dma.done.wait [#allocation11], 528  }
  0x2a   :  { %2699 = vsyncadd [#allocation11], 4294966768 }
  0x2b   :  { %151 = sfence }
  0x2c   :  { %s3691_s3 = sld [smem:[#allocation22_spill]]  ;;  %v153_v26 = vld [vmem:[#allocation6] sm:$0x77]  ;;  %v154_v29 = vld [vmem:[#allocation6 + $0x8] sm:$0x77]  ;;  %v3083_v54 = vld [vmem:[%s3662_s6 + $0x18] sm:$0xff] }
  0x2d   :  { %v225_v30 = vunpack.c.l.b16 %v153_v26  ;;  %v226_v31 = vunpack.c.h.b16 %v153_v26  ;;  %v227_v34 = vunpack.c.l.b16 %v154_v29  ;;  %v228_v35 = vunpack.c.h.b16 %v154_v29  ;;  %s3692_s0 = sld [smem:[#allocation24_spill]]  ;;  %v517_v50 = vld [vmem:[#allocation7] sm:$0x77]  ;;  %v518_v51 = vld [vmem:[#allocation7 + $0x8] sm:$0x77]  ;;  %v3099_v60 = vld [vmem:[%s3662_s6 + $0x8] sm:$0xff] }
  0x2e   :  { %v522_v52 = vunpack.c.h.b16 %v517_v50  ;;  %v523_v53 = vunpack.c.l.b16 %v518_v51  ;;  %v521_v55 = vunpack.c.l.b16 %v517_v50  ;;  %v3092_v58 = vld [vmem:[%s3662_s6 + $0x10] sm:$0xff]  ;;  %v3110_v61 = vld [vmem:[%s3662_s6] sm:$0xff]  ;;  %v2710_v62 = vmov 0.0   ;;  %v3161_v29 = vld [vmem:[%s3667_s11 + $0x8] sm:$0xff]  ;;  %s2711_s5 = smov 32   ;;  %s1440_s30 = sld [smem:[#allocation2]] }
  0x2f   :  { %v229_v38 = vpack.c.b16 %v225_v30, %v225_v30  ;;  %v230_v39 = vpack.c.b16 %v226_v31, %v226_v31  ;;  %v231_v40 = vpack.c.b16 %v227_v34, %v227_v34  ;;  %v232_v41 = vpack.c.b16 %v228_v35, %v228_v35  ;;  %v2431_v63 = vld [vmem:[#allocation9] ss:$0 sm:$0xff]  ;;  %v2432_v31 = vld [vmem:[#allocation10] ss:$0 sm:$0xff] }
  0x30   :  { %v526_v56 = vpack.c.b16 %v522_v52, %v522_v52  ;;  %v527_v57 = vpack.c.b16 %v523_v53, %v523_v53  ;;  %v525_v59 = vpack.c.b16 %v521_v55, %v521_v55  ;;  %vm493_vm0 = vcmask 523264   ;;  %v3143_v26 = vld [vmem:[%s3667_s11 + $0x20] sm:$0xff] }
  0x31   :  { %v3167_v30 = vld [vmem:[%s3667_s11] sm:$0xff]  ;;  %vm624_vm5 = vcmask 261120  }
  0x32   :  { %v2848_v0 = vld [vmem:[%s3691_s3 + $0x38] sm:$0xff]  ;;  %v2870_v4 = vld [vmem:[%s3691_s3 + $0x30] sm:$0xff]  ;;  %v2894_v8 = vld [vmem:[%s3691_s3 + $0x28] sm:$0xff] }
  0x33   :  { %v2853_v1 = vld [vmem:[%s3691_s3 + $0x78] sm:$0xff]  ;;  %429 = vmatpush.bf16.msra.mxu0 %v2848_v0  ;;  %v2875_v5 = vld [vmem:[%s3691_s3 + $0x70] sm:$0xff]  ;;  %v2899_v9 = vld [vmem:[%s3691_s3 + $0x68] sm:$0xff] }
  0x34   :  { %v2858_v2 = vld [vmem:[%s3691_s3 + $0xb8] sm:$0xff]  ;;  %442 = vmatpush.bf16.msra.mxu1 %v2853_v1  ;;  %v2882_v6 = vld [vmem:[%s3691_s3 + $0xb0] sm:$0xff]  ;;  %v2906_v10 = vld [vmem:[%s3691_s3 + $0xa8] sm:$0xff]  ;;  %s1443_s22 = ssub.f32 1.0, %s1440_s30 }
  0x35   :  { %v2863_v3 = vld [vmem:[%s3691_s3 + $0xf8] sm:$0xff]  ;;  %455 = vmatpush.bf16.msra.mxu2 %v2858_v2  ;;  %v2887_v7 = vld [vmem:[%s3691_s3 + $0xf0] sm:$0xff]  ;;  %v2911_v11 = vld [vmem:[%s3691_s3 + $0xe8] sm:$0xff] }
  0x36   :  { %468 = vmatpush.bf16.msra.mxu3 %v2863_v3  ;;  %v2918_v12 = vld [vmem:[%s3691_s3 + $0x20] sm:$0xff]  ;;  %v2942_v16 = vld [vmem:[%s3691_s3 + $0x18] sm:$0xff]  ;;  %v2966_v20 = vld [vmem:[%s3691_s3 + $0x10] sm:$0xff] }
  0x37   :  { %430 = vmatpush.bf16.msra.mxu0 %v2870_v4  ;;  %v2923_v13 = vld [vmem:[%s3691_s3 + $0x60] sm:$0xff]  ;;  %v2947_v17 = vld [vmem:[%s3691_s3 + $0x58] sm:$0xff]  ;;  %v2971_v21 = vld [vmem:[%s3691_s3 + $0x50] sm:$0xff] }
  0x38   :  { %443 = vmatpush.bf16.msra.mxu1 %v2875_v5  ;;  %v2928_v14 = vld [vmem:[%s3691_s3 + $0xa0] sm:$0xff]  ;;  %v2954_v18 = vld [vmem:[%s3691_s3 + $0x98] sm:$0xff]  ;;  %v2978_v22 = vld [vmem:[%s3691_s3 + $0x90] sm:$0xff] }
  0x39   :  { %456 = vmatpush.bf16.msra.mxu2 %v2882_v6  ;;  %v2935_v15 = vld [vmem:[%s3691_s3 + $0xe0] sm:$0xff]  ;;  %v2959_v19 = vld [vmem:[%s3691_s3 + $0xd8] sm:$0xff]  ;;  %v2983_v23 = vld [vmem:[%s3691_s3 + $0xd0] sm:$0xff] }
  0x3a   :  { %469 = vmatpush.bf16.msra.mxu3 %v2887_v7  ;;  %v2990_v24 = vld [vmem:[%s3691_s3 + $0x8] sm:$0xff]  ;;  %v3014_v32 = vld [vmem:[%s3691_s3] sm:$0xff]  ;;  %v488_v42 = vld [vmem:[%s3692_s0 + $0x38] sm:$0xff] }
  0x3b   :  { %431 = vmatpush.bf16.msra.mxu0 %v2894_v8  ;;  %v2995_v25 = vld [vmem:[%s3691_s3 + $0x48] sm:$0xff]  ;;  %v3019_v33 = vld [vmem:[%s3691_s3 + $0x40] sm:$0xff]  ;;  %v487_v43 = vld [vmem:[%s3692_s0 + $0x30] sm:$0xff] }
  0x3c   :  { %444 = vmatpush.bf16.msra.mxu1 %v2899_v9  ;;  %v3002_v27 = vld [vmem:[%s3691_s3 + $0x88] sm:$0xff]  ;;  %v2379_v36 = vld [vmem:[%s3691_s3 + $0x80] sm:$0xff]  ;;  %v484_v46 = vld [vmem:[%s3692_s0 + $0x18] sm:$0xff] }
  0x3d   :  { %457 = vmatpush.bf16.msra.mxu2 %v2906_v10  ;;  %v3007_v28 = vld [vmem:[%s3691_s3 + $0xc8] sm:$0xff]  ;;  %v3029_v37 = vld [vmem:[%s3691_s3 + $0xc0] sm:$0xff]  ;;  %v483_v47 = vld [vmem:[%s3692_s0 + $0x10] sm:$0xff] }
  0x3e   :  { %470 = vmatpush.bf16.msra.mxu3 %v2911_v11  ;;  %v486_v44 = vld [vmem:[%s3692_s0 + $0x28] sm:$0xff]  ;;  %v485_v45 = vld [vmem:[%s3692_s0 + $0x20] sm:$0xff] }
  0x3f   :  { %432 = vmatpush.bf16.msra.mxu0 %v2918_v12  ;;  %v482_v48 = vld [vmem:[%s3692_s0 + $0x8] sm:$0xff]  ;;  %v481_v49 = vld [vmem:[%s3692_s0] sm:$0xff] }
  0x40   :  { %445 = vmatpush.bf16.msra.mxu1 %v2923_v13 }
  0x41   :  { %458 = vmatpush.bf16.msra.mxu2 %v2928_v14 }
  0x42   :  { %471 = vmatpush.bf16.msra.mxu3 %v2935_v15 }
  0x43   :  { %433 = vmatpush.bf16.msra.mxu0 %v2942_v16 }
  0x44   :  { %446 = vmatpush.bf16.msra.mxu1 %v2947_v17 }
  0x45   :  { %459 = vmatpush.bf16.msra.mxu2 %v2954_v18 }
  0x46   :  { %472 = vmatpush.bf16.msra.mxu3 %v2959_v19 }
  0x47   :  { %434 = vmatpush.bf16.msra.mxu0 %v2966_v20 }
  0x48   :  { %447 = vmatpush.bf16.msra.mxu1 %v2971_v21 }
  0x49   :  { %460 = vmatpush.bf16.msra.mxu2 %v2978_v22 }
  0x4a   :  { %473 = vmatpush.bf16.msra.mxu3 %v2983_v23 }
  0x4b   :  { %435 = vmatpush.bf16.msra.mxu0 %v2990_v24 }
  0x4c   :  { %448 = vmatpush.bf16.msra.mxu1 %v2995_v25 }
  0x4d   :  { %461 = vmatpush.bf16.msra.mxu2 %v3002_v27 }
  0x4e   :  { %474 = vmatpush.bf16.msra.mxu3 %v3007_v28 }
  0x4f   :  { %436 = vmatpush.bf16.msra.mxu0 %v3014_v32 }
  0x50   :  { %449 = vmatpush.bf16.msra.mxu1 %v3019_v33 }
  0x51   :  { %462 = vmatpush.bf16.msra.mxu2 %v2379_v36 }
  0x52   :  { %475 = vmatpush.bf16.msra.mxu3 %v3029_v37  ;;  %437 = vmatmul.bf16.vlgmr.msra.gmra.mxu0 %v229_v38 }
  0x53   :  { %450 = vmatmul.bf16.vlgmr.msra.gmra.mxu1 %v230_v39  ;;  %505 = vmatpush.msrb.mxu0 %v488_v42 }
  0x54   :  { %463 = vmatmul.bf16.vlgmr.msra.gmra.mxu2 %v231_v40  ;;  %533 = vmatpush.bf16.msrb.mxu1 %v2848_v0 }
  0x55   :  { %546 = vmatpush.bf16.msrb.mxu2 %v2853_v1  ;;  %476 = vmatmul.bf16.vlgmr.msra.gmra.mxu3 %v232_v41 }
  0x56   :  { %559 = vmatpush.bf16.msrb.mxu3 %v2858_v2  ;;  %506 = vmatpush.msrb.mxu0 %v487_v43 }
  0x58   :  { %534 = vmatpush.bf16.msrb.mxu1 %v2870_v4  ;;  %507 = vmatpush.msrb.mxu0 %v486_v44 }
  0x59   :  { %547 = vmatpush.bf16.msrb.mxu2 %v2875_v5 }
  0x5a   :  { %560 = vmatpush.bf16.msrb.mxu3 %v2882_v6  ;;  %508 = vmatpush.msrb.mxu0 %v485_v45 }
  0x5c   :  { %535 = vmatpush.bf16.msrb.mxu1 %v2894_v8  ;;  %509 = vmatpush.msrb.mxu0 %v484_v46 }
  0x5d   :  { %548 = vmatpush.bf16.msrb.mxu2 %v2899_v9 }
  0x5e   :  { %561 = vmatpush.bf16.msrb.mxu3 %v2906_v10  ;;  %510 = vmatpush.msrb.mxu0 %v483_v47  ;;  %v524_v10 = vunpack.c.h.b16 %v518_v51 }
  0x60   :  { %536 = vmatpush.bf16.msrb.mxu1 %v2918_v12  ;;  %511 = vmatpush.msrb.mxu0 %v482_v48  ;;  %v3130_v12 = vld [vmem:[%s3667_s11 + $0x30] sm:$0xff] }
  0x61   :  { %549 = vmatpush.bf16.msrb.mxu2 %v2923_v13 }
  0x62   :  { %562 = vmatpush.bf16.msrb.mxu3 %v2928_v14  ;;  %512 = vmatpush.msrb.mxu0 %v481_v49 }
  0x64   :  { %572 = vmatpush.bf16.msra.mxu0 %v2863_v3  ;;  %537 = vmatpush.bf16.msrb.mxu1 %v2942_v16 }
  0x65   :  { %550 = vmatpush.bf16.msrb.mxu2 %v2947_v17 }
  0x66   :  { %563 = vmatpush.bf16.msrb.mxu3 %v2954_v18 }
  0x68   :  { %573 = vmatpush.bf16.msra.mxu0 %v2887_v7  ;;  %538 = vmatpush.bf16.msrb.mxu1 %v2966_v20 }
  0x69   :  { %551 = vmatpush.bf16.msrb.mxu2 %v2971_v21 }
  0x6a   :  { %564 = vmatpush.bf16.msrb.mxu3 %v2978_v22 }
  0x6c   :  { %574 = vmatpush.bf16.msra.mxu0 %v2911_v11  ;;  %539 = vmatpush.bf16.msrb.mxu1 %v2990_v24  ;;  %v3125_v11 = vld [vmem:[%s3667_s11 + $0x38] sm:$0xff] }
  0x6d   :  { %552 = vmatpush.bf16.msrb.mxu2 %v2995_v25  ;;  %v3137_v25 = vld [vmem:[%s3667_s11 + $0x28] sm:$0xff] }
  0x6e   :  { %565 = vmatpush.bf16.msrb.mxu3 %v3002_v27  ;;  %v3149_v27 = vld [vmem:[%s3667_s11 + $0x18] sm:$0xff] }
  0x70   :  { %575 = vmatpush.bf16.msra.mxu0 %v2935_v15  ;;  %540 = vmatpush.bf16.msrb.mxu1 %v3014_v32  ;;  %v528_v15 = vpack.c.b16 %v524_v10, %v524_v10 }
  0x71   :  { %553 = vmatpush.bf16.msrb.mxu2 %v3019_v33 }
  0x72   :  { %566 = vmatpush.bf16.msrb.mxu3 %v2379_v36 }
  0x73   :  { %541 = vmatmul.bf16.vlgmr.msrb.gmra.mxu1 %v525_v59 }
  0x74   :  { %554 = vmatmul.bf16.vlgmr.msrb.gmra.mxu2 %v526_v56  ;;  %576 = vmatpush.bf16.msra.mxu0 %v2959_v19 }
  0x75   :  { %640 = vmatpush.msra.mxu2 %v3083_v54  ;;  %567 = vmatmul.bf16.vlgmr.msrb.gmra.mxu3 %v527_v57 }
  0x76   :  { %608 = vmatpush.msra.mxu1 %v3125_v11 }
  0x77   :  { %641 = vmatpush.msra.mxu2 %v3092_v58 }
  0x78   :  { %577 = vmatpush.bf16.msra.mxu0 %v2983_v23  ;;  %609 = vmatpush.msra.mxu1 %v3130_v12 }
  0x79   :  { %642 = vmatpush.msra.mxu2 %v3099_v60 }
  0x7a   :  { %610 = vmatpush.msra.mxu1 %v3137_v25 }
  0x7b   :  { %643 = vmatpush.msra.mxu2 %v3110_v61 }
  0x7c   :  { %578 = vmatpush.bf16.msra.mxu0 %v3007_v28  ;;  %611 = vmatpush.msra.mxu1 %v3143_v26  ;;  %v3155_v28 = vld [vmem:[%s3667_s11 + $0x10] sm:$0xff] }
  0x7d   :  { %793 = vmatpush.msrb.mxu2 %v3083_v54 }
  0x7e   :  { %612 = vmatpush.msra.mxu1 %v3149_v27 }
  0x7f   :  { %794 = vmatpush.msrb.mxu2 %v3092_v58 }
  0x80   :  { %579 = vmatpush.bf16.msra.mxu0 %v3029_v37  ;;  %613 = vmatpush.msra.mxu1 %v3155_v28 }
  0x81   :  { %795 = vmatpush.msrb.mxu2 %v3099_v60 }
  0x82   :  { %614 = vmatpush.msra.mxu1 %v3161_v29 }
  0x83   :  { %796 = vmatpush.msrb.mxu2 %v3110_v61 }
  0x84   :  { %644 = vmatmul.f32.vlgmr.msra.gmra.mxu2 %v2710_v62  ;;  %615 = vmatpush.msra.mxu1 %v3167_v30 }
  0xcf   :  { %v438_v0 = vpop.f32.mrf.mxu0 }
  0xd0   :  { %v451_v1 = vpop.f32.mrf.mxu1  ;;  %v439_v2 = vadd.f32 %v2431_v63, %v438_v0  ;;  %v693_v0 = vld [vmem:[%s3665_s9 + $0x18] sm:$0xff] }
  0xd1   :  { %706 = vmatpush.msra.mxu3 %v693_v0  ;;  %1015 = vmatpush.msra.mxu2 %v693_v0 }
  0xd2   :  { %v452_v3 = vadd.f32 %v451_v1, %v439_v2  ;;  %v692_v1 = vld [vmem:[%s3665_s9 + $0x10] sm:$0xff]  ;;  %v689_v2 = vld [vmem:[%s3664_s8 + $0x18] sm:$0xff] }
  0xd3   :  { %731 = vmatpush.msrb.mxu1 %v689_v2  ;;  %707 = vmatpush.msra.mxu3 %v692_v1 }
  0xd4   :  { %1016 = vmatpush.msra.mxu2 %v692_v1 }
  0xd7   :  { %v464_v4 = vpop.f32.mrf.mxu2  ;;  %v440_v7 = vpop.f32.mrf.mxu0 }
  0xd8   :  { %v477_v5 = vpop.f32.mrf.mxu3  ;;  %v465_v6 = vadd.f32 %v464_v4, %v452_v3  ;;  %v453_v8 = vpop.f32.mrf.mxu1  ;;  %v688_v3 = vld [vmem:[%s3664_s8 + $0x10] sm:$0xff]  ;;  %v691_v4 = vld [vmem:[%s3665_s9 + $0x8] sm:$0xff]  ;;  %v686_v7 = vld [vmem:[%s3664_s8] sm:$0xff] }
  0xd9   :  { %732 = vmatpush.msrb.mxu1 %v688_v3  ;;  %708 = vmatpush.msra.mxu3 %v691_v4  ;;  %v3225_v8 = vld [vmem:[%s3666_s10] ss:$0 sm:$0xff] }
  0xda   :  { %v3118_v9 = vadd.f32 %v477_v5, %v465_v6  ;;  %v687_v5 = vld [vmem:[%s3664_s8 + $0x8] sm:$0xff]  ;;  %v690_v6 = vld [vmem:[%s3665_s9] sm:$0xff]  ;;  %1017 = vmatpush.msra.mxu2 %v691_v4  ;;  %s2712_s8 = smov 64  }
  0xdb   :  { %733 = vmatpush.msrb.mxu1 %v687_v5  ;;  %709 = vmatpush.msra.mxu3 %v690_v6 }
  0xdc   :  { %2221 = vmatmul.msk.f32.vlgmr.msrb.gmra.mxu0 %vm493_vm0, %v3118_v9  ;;  %1018 = vmatpush.msra.mxu2 %v690_v6 }
  0xdd   :  { %888 = vmatpush.msrb.mxu0 %v689_v2  ;;  %710 = vmatmul.f32.vlgmr.msra.gmra.mxu3 %v2710_v62 }
  0xde   :  { %734 = vmatpush.msrb.mxu1 %v686_v7  ;;  %862 = vmatpush.msrb.mxu3 %v693_v0 }
  0xdf   :  { %v466_v13 = vpop.f32.mrf.mxu2  ;;  %889 = vmatpush.msrb.mxu0 %v688_v3 }
  0xe0   :  { %v479_v14 = vpop.f32.mrf.mxu3  ;;  %863 = vmatpush.msrb.mxu3 %v692_v1 }
  0xe1   :  { %890 = vmatpush.msrb.mxu0 %v687_v5 }
  0xe2   :  { %864 = vmatpush.msrb.mxu3 %v691_v4 }
  0xe3   :  { %891 = vmatpush.msrb.mxu0 %v686_v7 }
  0xe4   :  { %580 = vmatmul.bf16.vlgmr.msra.gmra.mxu0 %v528_v15  ;;  %865 = vmatpush.msrb.mxu3 %v690_v6  ;;  %v1087_v6 = vrot.slane %v3118_v9, 4 }
  0xe5   :  { %1098 = vmatpush.msra.mxu0 %v3125_v11 }
  0xe6   :  { %1041 = vmatpush.msra.mxu3 %v689_v2 }
  0xe7   :  { %1099 = vmatpush.msra.mxu0 %v3130_v12 }
  0xe8   :  { %1042 = vmatpush.msra.mxu3 %v688_v3 }
  0xe9   :  { %1100 = vmatpush.msra.mxu0 %v3137_v25 }
  0xea   :  { %1043 = vmatpush.msra.mxu3 %v687_v5 }
  0xeb   :  { %1101 = vmatpush.msra.mxu0 %v3143_v26 }
  0xec   :  { %1044 = vmatpush.msra.mxu3 %v686_v7 }
  0xed   :  { %1102 = vmatpush.msra.mxu0 %v3149_v27 }
  0xef   :  { %1103 = vmatpush.msra.mxu0 %v3155_v28 }
  0xf0   :  { %v542_v16 = vpop.f32.mrf.mxu1 }
  0xf1   :  { %v543_v17 = vadd.f32 %v2431_v63, %v542_v16  ;;  %1104 = vmatpush.msra.mxu0 %v3161_v29 }
  0xf3   :  { %1105 = vmatpush.msra.mxu0 %v3167_v30 }
  0xf7   :  { %v555_v18 = vpop.f32.mrf.mxu2 }
  0xf8   :  { %v556_v19 = vadd.f32 %v555_v18, %v543_v17  ;;  %v568_v20 = vpop.f32.mrf.mxu3  ;;  %v544_v22 = vpop.f32.mrf.mxu1 }
  0xfa   :  { %v569_v21 = vadd.f32 %v568_v20, %v556_v19 }
  0xff   :  { %v557_v23 = vpop.f32.mrf.mxu2 }
 0x100   :  { %v570_v24 = vpop.f32.mrf.mxu3 }
 0x107   :  { %v645_v33 = vpop.f32.mrf.mxu2 }
 0x159   :  { %v514_v32 = vpop.f32.mrf.mxu0 }
 0x15a   :  { %v3170_v34 = vadd.f32 %v2432_v31, %v514_v32 }
 0x15c   :  { %v648_v35 = vadd.f32 %v645_v33, %v3170_v34 }
 0x15e   :  { %2440 = vtanh.f32 %v648_v35  ;;  %v2223_v40 = vmul.f32 -1.442695, %v648_v35 }
 0x160   :  { %2442 = vpow2.f32 %v2223_v40  ;;  %v711_v62 = vpop.f32.mrf.mxu3 }
 0x161   :  { %v581_v36 = vpop.f32.mrf.mxu0 }
 0x162   :  { %v582_v37 = vadd.f32 %v581_v36, %v569_v21 }
 0x164   :  { %v2441_v38 = vpop.eup %2440  ;;  %2222 = vmatmul.msk.f32.vlgmr.msra.gmra.mxu1 %vm493_vm0, %v582_v37 }
 0x165   :  { %671 = vrot.lane.b32.xlu0 %v2441_v38, %s2711_s5  ;;  %946 = vmatpush.msra.mxu1 %v3083_v54 }
 0x166   :  { %v2443_v41 = vpop.eup %2442 }
 0x167   :  { %v652_v42 = vadd.f32 1.0, %v2443_v41  ;;  %947 = vmatpush.msra.mxu1 %v3092_v58 }
 0x169   :  { %v583_v39 = vpop.f32.mrf.mxu0  ;;  %2444 = vrcp.f32 %v652_v42  ;;  %v664_v48 = vand.u32 2147483648, %v652_v42  ;;  %vm658_vm2 = vweird.f32 %v652_v42  ;;  %v662_v49 = vand.u32 2147483647, %v652_v42  ;;  %948 = vmatpush.msra.mxu1 %v3099_v60 }
 0x16b   :  { %v665_v51 = vor.u32 1.1754944e-38, %v664_v48  ;;  %vm663_vm4 = vcmp.eq.f32.partialorder %v662_v49, 8.507059e+37  ;;  %949 = vmatpush.msra.mxu1 %v3110_v61 }
 0x16f   :  { %v2445_v43 = vpop.eup %2444 }
 0x170   :  { %v654_v44 = vmul.f32 %v2445_v43, %v652_v42  ;;  %vm659_vm1 = vweird.f32 %v2445_v43 }
 0x171   :  { %vm660_vm3 = vmor %vm658_vm2, %vm659_vm1 }
 0x172   :  { %v655_v45 = vsub.f32 1.0, %v654_v44 }
 0x174   :  { %v656_v46 = vmul.f32 %v2445_v43, %v655_v45 }
 0x176   :  { %v657_v47 = vadd.f32 %v2445_v43, %v656_v46 }
 0x178   :  { %v661_v50 = vsel %vm660_vm3, %v2445_v43, %v657_v47 }
 0x179   :  { %v666_v53 = vsel %vm663_vm4, %v665_v51, %v661_v50 }
 0x17a   :  { %v669_v56 = vmul.f32 0.0, %v666_v53 }
 0x1d7   :  { %v672_v52 = vpop.permute.xlu0 %671 }
 0x1d8   :  { %v674_v55 = vmul.f32 %v672_v52, %v666_v53 }
 0x1da   :  { %676 = vrot.lane.b32.xlu0 %v674_v55, %s2711_s5 }
 0x1e1   :  { %v3220_v61 = vpop.f32.mrf.mxu1 }
 0x24c   :  { %v677_v57 = vpop.permute.xlu0 %676 }
 0x24d   :  { %v3176_v59 = vadd.f32 %v677_v57, %v669_v56 }
 0x24f   :  { %2446 = vtanh.f32 %v3176_v59  ;;  %v826_v52 = vrot.slane %v3176_v59, 6 }
 0x255   :  { %v2447_v63 = vpop.eup %2446 }
 0x256   :  { %682 = vrot.lane.b32.xlu1 %v2447_v63, %s2711_s5 }
 0x2c8   :  { %v683_v54 = vpop.permute.xlu1 %682 }
 0x2c9   :  { %v685_v58 = vmul.f32 %v683_v54, %v666_v53 }
 0x2cb   :  { %715 = vrot.lane.b32.xlu1 %v685_v58, %s2712_s8 }
 0x33d   :  { %v716_v60 = vpop.permute.xlu1 %715 }
 0x33e   :  { %2224 = vmatmul.msk.f32.vlgmr.msrb.gmra.mxu1 %vm624_vm5, %v716_v60  ;;  %2226 = vmatmul.msk.f32.vlgmr.msrb.gmra.mxu2 %vm624_vm5, %v716_v60 }
 0x3bb   :  { %v736_v10 = vpop.f32.mrf.mxu1 }
 0x3bc   :  { %v737_v11 = vadd.f32 %v736_v10, %v711_v62 }
 0x3be   :  { %v743_v12 = vadd.f32 %v3225_v8, %v737_v11 }
 0x3c0   :  { %2448 = vtanh.f32 %v743_v12  ;;  %v2225_v18 = vmul.f32 -1.442695, %v743_v12 }
 0x3c1   :  { %v798_v13 = vpop.f32.mrf.mxu2 }
 0x3c2   :  { %v802_v14 = vrot.slane %v798_v13, 6 }
 0x3c4   :  { %v804_v15 = vadd.f32 %v802_v14, %v3170_v34 }
 0x3c6   :  { %v2449_v16 = vpop.eup %2448  ;;  %2450 = vtanh.f32 %v804_v15  ;;  %v2227_v19 = vmul.f32 -1.442695, %v804_v15 }
 0x3c7   :  { %766 = vrot.lane.b32.xlu2 %v2449_v16, %s2711_s5  ;;  %2452 = vpow2.f32 %v2225_v18 }
 0x3c8   :  { %2454 = vpow2.f32 %v2227_v19 }
 0x3cc   :  { %v2451_v17 = vpop.eup %2450 }
 0x3cd   :  { %v2453_v20 = vpop.eup %2452 }
 0x3ce   :  { %v747_v21 = vadd.f32 1.0, %v2453_v20  ;;  %v2455_v22 = vpop.eup %2454 }
 0x3cf   :  { %830 = vrot.lane.b32.xlu2 %v2451_v17, %s2711_s5  ;;  %v808_v23 = vadd.f32 1.0, %v2455_v22 }
 0x3d0   :  { %2456 = vrcp.f32 %v747_v21  ;;  %v759_v32 = vand.u32 2147483648, %v747_v21  ;;  %vm753_vm7 = vweird.f32 %v747_v21  ;;  %v757_v33 = vand.u32 2147483647, %v747_v21 }
 0x3d1   :  { %2458 = vrcp.f32 %v808_v23  ;;  %v820_v42 = vand.u32 2147483648, %v808_v23  ;;  %vm814_vm11 = vweird.f32 %v808_v23  ;;  %v818_v43 = vand.u32 2147483647, %v808_v23 }
 0x3d2   :  { %v760_v37 = vor.u32 1.1754944e-38, %v759_v32  ;;  %vm758_vm9 = vcmp.eq.f32.partialorder %v757_v33, 8.507059e+37 }
 0x3d3   :  { %v821_v45 = vor.u32 1.1754944e-38, %v820_v42  ;;  %vm819_vm13 = vcmp.eq.f32.partialorder %v818_v43, 8.507059e+37 }
 0x3d6   :  { %v2457_v24 = vpop.eup %2456 }
 0x3d7   :  { %v749_v25 = vmul.f32 %v2457_v24, %v747_v21  ;;  %v2459_v27 = vpop.eup %2458  ;;  %vm754_vm6 = vweird.f32 %v2457_v24 }
 0x3d8   :  { %v810_v29 = vmul.f32 %v2459_v27, %v808_v23  ;;  %vm755_vm8 = vmor %vm753_vm7, %vm754_vm6  ;;  %vm815_vm10 = vweird.f32 %v2459_v27 }
 0x3d9   :  { %v750_v26 = vsub.f32 1.0, %v749_v25  ;;  %vm816_vm12 = vmor %vm814_vm11, %vm815_vm10 }
 0x3da   :  { %v811_v31 = vsub.f32 1.0, %v810_v29 }
 0x3db   :  { %v751_v28 = vmul.f32 %v2457_v24, %v750_v26 }
 0x3dc   :  { %v812_v36 = vmul.f32 %v2459_v27, %v811_v31 }
 0x3dd   :  { %v752_v30 = vadd.f32 %v2457_v24, %v751_v28 }
 0x3de   :  { %v813_v41 = vadd.f32 %v2459_v27, %v812_v36 }
 0x3df   :  { %v756_v35 = vsel %vm755_vm8, %v2457_v24, %v752_v30 }
 0x3e0   :  { %v761_v39 = vsel %vm758_vm9, %v760_v37, %v756_v35  ;;  %v817_v44 = vsel %vm816_vm12, %v2459_v27, %v813_v41 }
 0x3e1   :  { %v822_v46 = vsel %vm819_vm13, %v821_v45, %v817_v44  ;;  %v764_v49 = vmul.f32 0.0, %v761_v39 }
 0x3e2   :  { %v828_v53 = vmul.f32 %v826_v52, %v822_v46 }
 0x421   :  { %v767_v38 = vpop.permute.xlu2 %766 }
 0x422   :  { %v769_v40 = vmul.f32 %v767_v38, %v761_v39 }
 0x424   :  { %771 = vrot.lane.b32.xlu0 %v769_v40, %s2711_s5 }
 0x429   :  { %v831_v47 = vpop.permute.xlu2 %830 }
 0x42a   :  { %v833_v48 = vmul.f32 %v831_v47, %v822_v46 }
 0x42c   :  { %835 = vrot.lane.b32.xlu1 %v833_v48, %s2711_s5 }
 0x496   :  { %v772_v50 = vpop.permute.xlu0 %771 }
 0x497   :  { %v3233_v51 = vadd.f32 %v772_v50, %v764_v49 }
 0x499   :  { %2460 = vtanh.f32 %v3233_v51 }
 0x49e   :  { %v836_v55 = vpop.permute.xlu1 %835 }
 0x49f   :  { %v2461_v56 = vpop.eup %2460  ;;  %v3237_v57 = vadd.f32 %v836_v55, %v828_v53  ;;  %v3268_v53 = vld [vmem:[%s3668_s12 + $0x18] sm:$0xff]  ;;  %v3273_v55 = vld [vmem:[%s3668_s12 + $0x10] sm:$0xff] }
 0x4a0   :  { %777 = vrot.lane.b32.xlu2 %v2461_v56, %s2711_s5  ;;  %1126 = vmatpush.msrb.mxu1 %v3268_v53 }
 0x4a1   :  { %2462 = vtanh.f32 %v3237_v57  ;;  %v979_v43 = vrot.slane %v3237_v57, 6 }
 0x4a2   :  { %1127 = vmatpush.msrb.mxu1 %v3273_v55 }
 0x4a7   :  { %v2463_v63 = vpop.eup %2462 }
 0x4a8   :  { %841 = vrot.lane.b32.xlu0 %v2463_v63, %s2711_s5 }
 0x4fa   :  { %v778_v0 = vpop.permute.xlu2 %777 }
 0x4fb   :  { %v780_v1 = vmul.f32 %v778_v0, %v761_v39 }
 0x4fd   :  { %846 = vrot.lane.b32.xlu1 %v780_v1, %s2712_s8 }
 0x51a   :  { %v842_v2 = vpop.permute.xlu0 %841 }
 0x51b   :  { %v844_v3 = vmul.f32 %v842_v2, %v822_v46  ;;  %v3288_v2 = vld [vmem:[%s3668_s12] sm:$0xff] }
 0x51d   :  { %v871_v4 = vrot.slane %v844_v3, 2 }
 0x51f   :  { %872 = vrot.lane.b32.xlu2 %v871_v4, %s2712_s8 }
 0x56f   :  { %v847_v59 = vpop.permute.xlu1 %846 }
 0x570   :  { %2228 = vmatmul.msk.f32.vlgmr.msrb.gmra.mxu3 %vm624_vm5, %v847_v59 }
 0x579   :  { %v873_v5 = vpop.permute.xlu2 %872 }
 0x57a   :  { %2229 = vmatmul.msk.f32.vlgmr.msrb.gmra.mxu0 %vm624_vm5, %v873_v5  ;;  %2231 = vmatmul.msk.f32.vlgmr.msra.gmra.mxu1 %vm624_vm5, %v873_v5  ;;  %v3297_v5 = vld [vmem:[%s3669_s13] ss:$0 sm:$0xff] }
 0x582   :  { %2236 = vmatmul.msk.f32.vlgmr.msra.gmra.mxu0 %vm493_vm0, %v1087_v6 }
 0x5f3   :  { %v867_v7 = vpop.f32.mrf.mxu3 }
 0x5f7   :  { %v893_v54 = vpop.f32.mrf.mxu0  ;;  %v951_v58 = vpop.f32.mrf.mxu1 }
 0x5f8   :  { %v894_v60 = vadd.f32 %v893_v54, %v867_v7  ;;  %v955_v62 = vrot.slane %v951_v58, 4 }
 0x5fa   :  { %v896_v10 = vadd.f32 %v3225_v8, %v894_v60  ;;  %v957_v11 = vadd.f32 %v955_v62, %v3170_v34 }
 0x5fc   :  { %2464 = vtanh.f32 %v896_v10  ;;  %v2230_v9 = vmul.f32 -1.442695, %v896_v10  ;;  %v2232_v14 = vmul.f32 -1.442695, %v957_v11 }
 0x5fd   :  { %2466 = vtanh.f32 %v957_v11 }
 0x5fe   :  { %2468 = vpow2.f32 %v2230_v9 }
 0x5ff   :  { %2470 = vpow2.f32 %v2232_v14  ;;  %v1107_v59 = vpop.f32.mrf.mxu0 }
 0x600   :  { %v1108_v6 = vadd.f32 %v3297_v5, %v1107_v59  ;;  %v3346_v59 = vld [vmem:[%s3670_s14 + $0x10] sm:$0xff] }
 0x602   :  { %v2465_v12 = vpop.eup %2464 }
 0x603   :  { %v2467_v13 = vpop.eup %2466  ;;  %919 = vrot.lane.b32.xlu1 %v2465_v12, %s2711_s5 }
 0x604   :  { %983 = vrot.lane.b32.xlu0 %v2467_v13, %s2711_s5  ;;  %v2469_v15 = vpop.eup %2468 }
 0x605   :  { %v2471_v16 = vpop.eup %2470  ;;  %v900_v17 = vadd.f32 1.0, %v2469_v15 }
 0x606   :  { %v961_v18 = vadd.f32 1.0, %v2471_v16 }
 0x607   :  { %2472 = vrcp.f32 %v900_v17  ;;  %v912_v28 = vand.u32 2147483648, %v900_v17  ;;  %vm906_vm0 = vweird.f32 %v900_v17  ;;  %v910_v30 = vand.u32 2147483647, %v900_v17 }
 0x608   :  { %2474 = vrcp.f32 %v961_v18  ;;  %v973_v29 = vand.u32 2147483648, %v961_v18  ;;  %vm967_vm1 = vweird.f32 %v961_v18  ;;  %v971_v31 = vand.u32 2147483647, %v961_v18 }
 0x609   :  { %v913_v35 = vor.u32 1.1754944e-38, %v912_v28  ;;  %vm911_vm4 = vcmp.eq.f32.partialorder %v910_v30, 8.507059e+37 }
 0x60a   :  { %v974_v36 = vor.u32 1.1754944e-38, %v973_v29  ;;  %vm972_vm6 = vcmp.eq.f32.partialorder %v971_v31, 8.507059e+37 }
 0x60d   :  { %v2473_v19 = vpop.eup %2472 }
 0x60e   :  { %v2475_v34 = vpop.eup %2474  ;;  %v902_v20 = vmul.f32 %v2473_v19, %v900_v17  ;;  %vm907_vm14 = vweird.f32 %v2473_v19 }
 0x60f   :  { %v963_v21 = vmul.f32 %v2475_v34, %v961_v18  ;;  %vm968_vm15 = vweird.f32 %v2475_v34  ;;  %vm908_vm2 = vmor %vm906_vm0, %vm907_vm14 }
 0x610   :  { %v903_v22 = vsub.f32 1.0, %v902_v20  ;;  %vm969_vm3 = vmor %vm967_vm1, %vm968_vm15 }
 0x611   :  { %v964_v23 = vsub.f32 1.0, %v963_v21 }
 0x612   :  { %v904_v24 = vmul.f32 %v2473_v19, %v903_v22 }
 0x613   :  { %v965_v25 = vmul.f32 %v2475_v34, %v964_v23 }
 0x614   :  { %v905_v26 = vadd.f32 %v2473_v19, %v904_v24 }
 0x615   :  { %v966_v27 = vadd.f32 %v2475_v34, %v965_v25 }
 0x616   :  { %v909_v32 = vsel %vm908_vm2, %v2473_v19, %v905_v26 }
 0x617   :  { %v970_v33 = vsel %vm969_vm3, %v2475_v34, %v966_v27  ;;  %v914_v38 = vsel %vm911_vm4, %v913_v35, %v909_v32  ;;  %vm1399_vm3 = vcmask 1041408   ;;  %vm1401_vm4 = vcmask 1045508  }
 0x618   :  { %v975_v40 = vsel %vm972_vm6, %v974_v36, %v970_v33  ;;  %v917_v48 = vmul.f32 %v914_v38, %v3233_v51  ;;  %v3279_v51 = vld [vmem:[%s3668_s12 + $0x8] sm:$0xff]  ;;  %vm1403_vm6 = vcmask 1043456   ;;  %s2321_s12 = sld [smem:[#allocation2 + $0x1]] }
 0x619   :  { %v981_v44 = vmul.f32 %v979_v43, %v975_v40  ;;  %1128 = vmatpush.msrb.mxu1 %v3279_v51 }
 0x61b   :  { %1129 = vmatpush.msrb.mxu1 %v3288_v2 }
 0x61e   :  { %s1770_s13 = ssub.f32 1.0, %s2321_s12 }
 0x675   :  { %v920_v37 = vpop.permute.xlu1 %919 }
 0x676   :  { %v984_v39 = vpop.permute.xlu0 %983  ;;  %v922_v41 = vmul.f32 %v920_v37, %v914_v38 }
 0x677   :  { %v986_v42 = vmul.f32 %v984_v39, %v975_v40 }
 0x678   :  { %924 = vrot.lane.b32.xlu0 %v922_v41, %s2711_s5 }
 0x679   :  { %988 = vrot.lane.b32.xlu2 %v986_v42, %s2711_s5 }
 0x6d3   :  { %v989_v45 = vpop.permute.xlu2 %988 }
 0x6d4   :  { %v3256_v46 = vadd.f32 %v989_v45, %v981_v44 }
 0x6d6   :  { %2476 = vtanh.f32 %v3256_v46  ;;  %v1156_v41 = vrot.slane %v3256_v46, 4  ;;  %v3315_v46 = vld [vmem:[%s3671_s15 + $0x18] sm:$0xff] }
 0x6d7   :  { %1200 = vmatpush.msrb.mxu2 %v3315_v46 }
 0x6dc   :  { %v2477_v47 = vpop.eup %2476 }
 0x6dd   :  { %994 = vrot.lane.b32.xlu1 %v2477_v47, %s2711_s5 }
 0x6ea   :  { %v925_v49 = vpop.permute.xlu0 %924 }
 0x6eb   :  { %v3261_v50 = vadd.f32 %v925_v49, %v917_v48 }
 0x6ed   :  { %2478 = vtanh.f32 %v3261_v50 }
 0x6f3   :  { %v2479_v52 = vpop.eup %2478 }
 0x6f4   :  { %930 = vrot.lane.b32.xlu2 %v2479_v52, %s2711_s5 }
 0x74e   :  { %v931_v56 = vpop.permute.xlu2 %930 }
 0x74f   :  { %v995_v57 = vpop.permute.xlu1 %994  ;;  %v933_v63 = vmul.f32 %v931_v56, %v914_v38  ;;  %v3320_v56 = vld [vmem:[%s3671_s15 + $0x10] sm:$0xff] }
 0x750   :  { %v997_v0 = vmul.f32 %v995_v57, %v975_v40  ;;  %1201 = vmatpush.msrb.mxu2 %v3320_v56  ;;  %v3332_v57 = vld [vmem:[%s3671_s15] sm:$0xff] }
 0x751   :  { %999 = vrot.lane.b32.xlu0 %v933_v63, %s2712_s8 }
 0x752   :  { %v1024_v1 = vrot.slane %v997_v0, 4 }
 0x754   :  { %1025 = vrot.lane.b32.xlu1 %v1024_v1, %s2712_s8 }
 0x7c3   :  { %v1000_v3 = vpop.permute.xlu0 %999 }
 0x7c4   :  { %2233 = vmatmul.msk.f32.vlgmr.msra.gmra.mxu2 %vm624_vm5, %v1000_v3 }
 0x7c6   :  { %v1026_v4 = vpop.permute.xlu1 %1025 }
 0x7c7   :  { %2234 = vmatmul.msk.f32.vlgmr.msra.gmra.mxu3 %vm624_vm5, %v1026_v4  ;;  %2237 = vmatmul.msk.f32.vlgmr.msrb.gmra.mxu1 %vm624_vm5, %v1026_v4  ;;  %v3341_v4 = vld [vmem:[%s3670_s14 + $0x18] sm:$0xff] }
 0x7c8   :  { %1225 = vmatpush.msrb.mxu3 %v3341_v4 }
 0x7ca   :  { %1226 = vmatpush.msrb.mxu3 %v3346_v59 }
 0x844   :  { %v1131_v7 = vpop.f32.mrf.mxu1 }
 0x845   :  { %v1134_v54 = vadd.f32 %v1131_v7, %v1108_v6  ;;  %v3352_v6 = vld [vmem:[%s3670_s14 + $0x8] sm:$0xff]  ;;  %v3358_v7 = vld [vmem:[%s3670_s14] sm:$0xff] }
 0x846   :  { %1227 = vmatpush.msrb.mxu3 %v3352_v6 }
 0x847   :  { %2480 = vtanh.f32 %v1134_v54  ;;  %v1020_v58 = vpop.f32.mrf.mxu2  ;;  %v2238_v15 = vmul.f32 -1.442695, %v1134_v54 }
 0x848   :  { %1228 = vmatpush.msrb.mxu3 %v3358_v7 }
 0x84a   :  { %v1046_v60 = vpop.f32.mrf.mxu3 }
 0x84b   :  { %v1047_v62 = vadd.f32 %v1046_v60, %v1020_v58  ;;  %v2435_v60 = vld [vmem:[%s3672_s16] ss:$0 sm:$0xff] }
 0x84d   :  { %v2481_v10 = vpop.eup %2480  ;;  %v1049_v11 = vadd.f32 %v3225_v8, %v1047_v62 }
 0x84e   :  { %1160 = vrot.lane.b32.xlu0 %v2481_v10, %s2711_s5 }
 0x84f   :  { %2482 = vtanh.f32 %v1049_v11  ;;  %v2235_v13 = vmul.f32 -1.442695, %v1049_v11 }
 0x851   :  { %2484 = vpow2.f32 %v2235_v13 }
 0x855   :  { %v2483_v12 = vpop.eup %2482 }
 0x856   :  { %1072 = vrot.lane.b32.xlu2 %v2483_v12, %s2711_s5 }
 0x857   :  { %v2485_v9 = vpop.eup %2484 }
 0x858   :  { %v1053_v14 = vadd.f32 1.0, %v2485_v9 }
 0x85a   :  { %2486 = vrcp.f32 %v1053_v14  ;;  %v1065_v22 = vand.u32 2147483648, %v1053_v14  ;;  %vm1059_vm8 = vweird.f32 %v1053_v14  ;;  %v1063_v23 = vand.u32 2147483647, %v1053_v14 }
 0x85b   :  { %2488 = vpow2.f32 %v2238_v15 }
 0x85c   :  { %v1066_v26 = vor.u32 1.1754944e-38, %v1065_v22  ;;  %vm1064_vm10 = vcmp.eq.f32.partialorder %v1063_v23, 8.507059e+37 }
 0x860   :  { %v2487_v16 = vpop.eup %2486 }
 0x861   :  { %v2489_v17 = vpop.eup %2488  ;;  %v1055_v18 = vmul.f32 %v2487_v16, %v1053_v14  ;;  %vm1060_vm7 = vweird.f32 %v2487_v16 }
 0x862   :  { %v1138_v19 = vadd.f32 1.0, %v2489_v17  ;;  %vm1061_vm9 = vmor %vm1059_vm8, %vm1060_vm7 }
 0x863   :  { %v1056_v34 = vsub.f32 1.0, %v1055_v18 }
 0x864   :  { %2490 = vrcp.f32 %v1138_v19  ;;  %v1150_v33 = vand.u32 2147483648, %v1138_v19  ;;  %vm1144_vm12 = vweird.f32 %v1138_v19  ;;  %v1148_v35 = vand.u32 2147483647, %v1138_v19 }
 0x865   :  { %v1057_v8 = vmul.f32 %v2487_v16, %v1056_v34 }
 0x866   :  { %v1151_v37 = vor.u32 1.1754944e-38, %v1150_v33  ;;  %vm1149_vm14 = vcmp.eq.f32.partialorder %v1148_v35, 8.507059e+37  ;;  %v2260_v33 = vld [vmem:[%s3675_s19 + $0x20] sm:$0xf]  ;;  %v2401_v35 = vld [vmem:[%s3675_s19 + $0x2c] sm:$0xf0] }
 0x867   :  { %v1058_v20 = vadd.f32 %v2487_v16, %v1057_v8 }
 0x869   :  { %v1062_v24 = vsel %vm1061_vm9, %v2487_v16, %v1058_v20 }
 0x86a   :  { %v2491_v21 = vpop.eup %2490  ;;  %v1067_v28 = vsel %vm1064_vm10, %v1066_v26, %v1062_v24 }
 0x86b   :  { %v1140_v25 = vmul.f32 %v2491_v21, %v1138_v19  ;;  %vm1145_vm11 = vweird.f32 %v2491_v21  ;;  %v1070_v45 = vmul.f32 %v1067_v28, %v3261_v50  ;;  %v3326_v50 = vld [vmem:[%s3671_s15 + $0x8] sm:$0xff] }
 0x86c   :  { %vm1146_vm13 = vmor %vm1144_vm12, %vm1145_vm11  ;;  %1202 = vmatpush.msrb.mxu2 %v3326_v50 }
 0x86d   :  { %v1141_v30 = vsub.f32 1.0, %v1140_v25 }
 0x86e   :  { %1203 = vmatpush.msrb.mxu2 %v3332_v57 }
 0x86f   :  { %v1142_v31 = vmul.f32 %v2491_v21, %v1141_v30 }
 0x871   :  { %v1143_v32 = vadd.f32 %v2491_v21, %v1142_v31 }
 0x873   :  { %v1147_v36 = vsel %vm1146_vm13, %v2491_v21, %v1143_v32 }
 0x874   :  { %v1152_v38 = vsel %vm1149_vm14, %v1151_v37, %v1147_v36  ;;  %v2399_v36 = vld [vmem:[%s3675_s19 + $0x24] sm:$0xf]  ;;  %v2261_v37 = vor.u32 %v2401_v35, %v2260_v33 }
 0x875   :  { %v1158_v42 = vmul.f32 %v1156_v41, %v1152_v38 }
 0x876   :  { %1346 = vmatpush.bf16.msra.mxu1 %v2261_v37 }
 0x8b0   :  { %v1073_v27 = vpop.permute.xlu2 %1072 }
 0x8b1   :  { %v1075_v29 = vmul.f32 %v1073_v27, %v1067_v28 }
 0x8b3   :  { %1077 = vrot.lane.b32.xlu1 %v1075_v29, %s2711_s5 }
 0x8c0   :  { %v1161_v39 = vpop.permute.xlu0 %1160 }
 0x8c1   :  { %v1163_v40 = vmul.f32 %v1161_v39, %v1152_v38  ;;  %v2268_v39 = vld [vmem:[%s3675_s19 + $0x28] sm:$0xf] }
 0x8c3   :  { %1165 = vrot.lane.b32.xlu2 %v1163_v40, %s2711_s5  ;;  %v2402_v40 = vld [vmem:[%s3675_s19 + $0x34] sm:$0xf0] }
 0x91d   :  { %v1166_v43 = vpop.permute.xlu2 %1165 }
 0x91e   :  { %v3306_v44 = vadd.f32 %v1166_v43, %v1158_v42  ;;  %v2269_v42 = vor.u32 %v2402_v40, %v2268_v39  ;;  %v2400_v43 = vld [vmem:[%s3675_s19 + $0x2c] sm:$0xf]  ;;  %v3469_v39 = vadd.f32 %v3297_v5, %v3220_v61 }
 0x920   :  { %2492 = vtanh.f32 %v3306_v44  ;;  %1372 = vmatpush.bf16.msra.mxu3 %v2269_v42 }
 0x925   :  { %v1078_v47 = vpop.permute.xlu1 %1077 }
 0x926   :  { %v2493_v48 = vpop.eup %2492  ;;  %v1080_v49 = vadd.f32 %v1078_v47, %v1070_v45  ;;  %v2270_v45 = vld [vmem:[%s3675_s19 + $0x38] sm:$0xf0]  ;;  %v2244_v47 = vld [vmem:[%s3675_s19] sm:$0xf] }
 0x927   :  { %1171 = vrot.lane.b32.xlu1 %v2493_v48, %s2711_s5  ;;  %v2273_v48 = vor.u32 %v2400_v43, %v2270_v45  ;;  %v1444_v43 = vstv %s1443_s22 }
 0x928   :  { %2494 = vtanh.f32 %v1080_v49 }
 0x929   :  { %1385 = vmatpush.bf16.msrb.mxu0 %v2273_v48 }
 0x92e   :  { %v2495_v52 = vpop.eup %2494 }
 0x92f   :  { %1083 = vrot.lane.b32.xlu0 %v2495_v52, %s2711_s5  ;;  %v2395_v52 = vld [vmem:[%s3675_s19 + $0x4] sm:$0xf] }
 0x999   :  { %v1172_v63 = vpop.permute.xlu1 %1171 }
 0x99a   :  { %v1174_v0 = vmul.f32 %v1172_v63, %v1152_v38  ;;  %v2262_v38 = vld [vmem:[%s3675_s19 + $0x30] sm:$0xf0] }
 0x99b   :  { %v2265_v41 = vor.u32 %v2399_v36, %v2262_v38  ;;  %v2246_v63 = vld [vmem:[%s3675_s19 + $0x10] sm:$0xf0]  ;;  %v2436_v36 = vld [vmem:[%s3674_s18] ss:$0 sm:$0xff] }
 0x99c   :  { %1209 = vrot.lane.b32.xlu0 %v1174_v0, %s2712_s8 }
 0x99d   :  { %1359 = vmatpush.bf16.msra.mxu2 %v2265_v41  ;;  %v1441_v41 = vstv %s1440_s30 }
 0x9a1   :  { %v1084_v1 = vpop.permute.xlu0 %1083 }
 0x9a2   :  { %v1086_v3 = vmul.f32 %v1084_v1, %v1067_v28  ;;  %v2249_v1 = vor.u32 %v2395_v52, %v2246_v63 }
 0x9a4   :  { %1184 = vrot.lane.b32.xlu2 %v1086_v3, %s2712_s8  ;;  %v2252_v3 = vld [vmem:[%s3675_s19 + $0x8] sm:$0xf]  ;;  %1360 = vmatpush.bf16.msra.mxu2 %v2249_v1 }
 0x9fe   :  { %v1185_v54 = vpop.permute.xlu2 %1184 }
 0x9ff   :  { %2239 = vmatmul.msk.f32.vlgmr.msrb.gmra.mxu2 %vm624_vm5, %v1185_v54  ;;  %v2398_v54 = vld [vmem:[%s3675_s19 + $0x14] sm:$0xf0] }
 0xa00   :  { %1463 = vmatpush.msrb.mxu2 %v3268_v53 }
 0xa02   :  { %1464 = vmatpush.msrb.mxu2 %v3273_v55 }
 0xa04   :  { %1465 = vmatpush.msrb.mxu2 %v3279_v51 }
 0xa06   :  { %1466 = vmatpush.msrb.mxu2 %v3288_v2 }
 0xa0e   :  { %v3363_v58 = vpop.permute.xlu0 %1209 }
 0xa0f   :  { %2240 = vmatmul.msk.f32.vlgmr.msrb.gmra.mxu3 %vm624_vm5, %v3363_v58 }
 0xa82   :  { %v1205_v62 = vpop.f32.mrf.mxu2 }
 0xa92   :  { %v1230_v10 = vpop.f32.mrf.mxu3 }
 0xa93   :  { %v1231_v11 = vadd.f32 %v1230_v10, %v1205_v62  ;;  %v2253_v62 = vor.u32 %v2398_v54, %v2252_v3  ;;  %v2254_v10 = vld [vmem:[%s3675_s19 + $0x18] sm:$0xf0] }
 0xa95   :  { %v1237_v12 = vadd.f32 %v2435_v60, %v1231_v11  ;;  %v2396_v60 = vld [vmem:[%s3675_s19 + $0xc] sm:$0xf]  ;;  %1373 = vmatpush.bf16.msra.mxu3 %v2253_v62 }
 0xa96   :  { %v2257_v11 = vor.u32 %v2396_v60, %v2254_v10 }
 0xa97   :  { %2496 = vtanh.f32 %v1237_v12  ;;  %v2241_v9 = vmul.f32 -1.442695, %v1237_v12  ;;  %v3438_v12 = vld [vmem:[#allocation12 + $0x18] sm:$0xff] }
 0xa98   :  { %1386 = vmatpush.bf16.msrb.mxu0 %v2257_v11 }
 0xa99   :  { %2498 = vpow2.f32 %v2241_v9  ;;  %1529 = vmatpush.msrb.mxu3 %v3315_v46  ;;  %v3443_v9 = vld [vmem:[#allocation12 + $0x8] sm:$0xff] }
 0xa9b   :  { %1530 = vmatpush.msrb.mxu3 %v3320_v56 }
 0xa9c   :  { %1554 = vmatpush.msra.mxu0 %v3341_v4 }
 0xa9d   :  { %v2497_v13 = vpop.eup %2496  ;;  %1531 = vmatpush.msrb.mxu3 %v3326_v50 }
 0xa9e   :  { %1260 = vrot.lane.b32.xlu1 %v2497_v13, %s2711_s5  ;;  %1555 = vmatpush.msra.mxu0 %v3346_v59  ;;  %v3440_v13 = vld [vmem:[#allocation12 + $0x10] sm:$0xff] }
 0xa9f   :  { %v2499_v14 = vpop.eup %2498  ;;  %1532 = vmatpush.msrb.mxu3 %v3332_v57 }
 0xaa0   :  { %v1241_v15 = vadd.f32 1.0, %v2499_v14  ;;  %1556 = vmatpush.msra.mxu0 %v3352_v6  ;;  %v3446_v14 = vld [vmem:[#allocation12] sm:$0xff] }
 0xaa2   :  { %2500 = vrcp.f32 %v1241_v15  ;;  %v1253_v8 = vand.u32 2147483648, %v1241_v15  ;;  %vm1247_vm0 = vweird.f32 %v1241_v15  ;;  %v1251_v20 = vand.u32 2147483647, %v1241_v15  ;;  %1557 = vmatpush.msra.mxu0 %v3358_v7 }
 0xaa4   :  { %v1254_v22 = vor.u32 1.1754944e-38, %v1253_v8  ;;  %vm1252_vm2 = vcmp.eq.f32.partialorder %v1251_v20, 8.507059e+37 }
 0xaa8   :  { %v2501_v16 = vpop.eup %2500 }
 0xaa9   :  { %v1243_v17 = vmul.f32 %v2501_v16, %v1241_v15  ;;  %vm1248_vm15 = vweird.f32 %v2501_v16 }
 0xaaa   :  { %vm1249_vm1 = vmor %vm1247_vm0, %vm1248_vm15 }
 0xaab   :  { %v1244_v18 = vsub.f32 1.0, %v1243_v17  ;;  %v1284_v17 = vld [vmem:[%s3676_s20] sm:$0xf] }
 0xaac   :  { %v1287_v8 = vperm.slane %v1284_v17, 1  ;;  %v1288_v20 = vperm.slane %v1284_v17, 2 }
 0xaad   :  { %v1245_v19 = vmul.f32 %v2501_v16, %v1244_v18 }
 0xaaf   :  { %v1246_v34 = vadd.f32 %v2501_v16, %v1245_v19 }
 0xab1   :  { %v1250_v21 = vsel %vm1249_vm1, %v2501_v16, %v1246_v34  ;;  %v1289_v34 = vperm.slane %v1284_v17, 3 }
 0xab2   :  { %v1255_v24 = vsel %vm1252_vm2, %v1254_v22, %v1250_v21  ;;  %v1286_v21 = vperm.slane %v1284_v17, 0 }
 0xab3   :  { %v1258_v26 = vmul.f32 %v1255_v24, %v1080_v49  ;;  %v2397_v49 = vld [vmem:[%s3675_s19 + $0xc] sm:$0xf0] }
 0xab4   :  { %v2245_v0 = vor.u32 %v2397_v49, %v2244_v47  ;;  %v1442_v47 = vmul.f32 %v1441_v41, %v3469_v39 }
 0xab6   :  { %1347 = vmatpush.bf16.msra.mxu1 %v2245_v0 }
 0xaba   :  { %1432 = vmatpush.msrb.mxu1 %v3438_v12 }
 0xabc   :  { %1433 = vmatpush.msrb.mxu1 %v3440_v13 }
 0xabe   :  { %1434 = vmatpush.msrb.mxu1 %v3443_v9 }
 0xac0   :  { %1435 = vmatpush.msrb.mxu1 %v3446_v14 }
 0xb10   :  { %v1261_v23 = vpop.permute.xlu1 %1260 }
 0xb11   :  { %v1263_v25 = vmul.f32 %v1261_v23, %v1255_v24 }
 0xb13   :  { %1265 = vrot.lane.b32.xlu2 %v1263_v25, %s2711_s5 }
 0xb6d   :  { %v1266_v27 = vpop.permute.xlu2 %1265 }
 0xb6e   :  { %v3372_v28 = vadd.f32 %v1266_v27, %v1258_v26 }
 0xb70   :  { %2502 = vtanh.f32 %v3372_v28 }
 0xb76   :  { %v2503_v29 = vpop.eup %2502 }
 0xb77   :  { %1271 = vrot.lane.b32.xlu0 %v2503_v29, %s2711_s5 }
 0xbe9   :  { %v1272_v30 = vpop.permute.xlu0 %1271 }
 0xbea   :  { %v1274_v31 = vmul.f32 %v1272_v30, %v1255_v24 }
 0xbec   :  { %v1275_v32 = vpack.c.bf16 %v1274_v31, %v1274_v31  ;;  %1416 = vrot.lane.b32.xlu2 %v1274_v31, %s2712_s8 }
 0xbee   :  { %1295 = vrot.lane.b32.xlu1 %v1275_v32, %s2712_s8 }
 0xc46   :  { %v1417_v16 = vpop.permute.xlu2 %1416 }
 0xc60   :  { %v1296_v15 = vpop.permute.xlu1 %1295 }
 0xc61   :  { %2274 = vmatmul.msk.bf16.vlgmr.msra.gmra.mxu1 %vm624_vm5, %v1296_v15  ;;  %2275 = vmatmul.msk.bf16.vlgmr.msra.gmra.mxu2 %vm624_vm5, %v1296_v15 }
 0xc62   :  { %2276 = vmatmul.msk.bf16.vlgmr.msra.gmra.mxu3 %vm624_vm5, %v1296_v15  ;;  %2277 = vmatmul.msk.bf16.vlgmr.msrb.gmra.mxu0 %vm624_vm5, %v1296_v15 }
 0xc71   :  { %2278 = vmatmul.msk.f32.vlgmr.msrb.gmra.mxu1 %vm624_vm5, %v1417_v16  ;;  %2279 = vmatmul.msk.f32.vlgmr.msrb.gmra.mxu2 %vm624_vm5, %v3363_v58 }
 0xc72   :  { %2281 = vmatmul.msk.f32.vlgmr.msrb.gmra.mxu3 %vm624_vm5, %v1417_v16 }
 0xcde   :  { %v1349_v18 = vpop.f32.mrf.mxu1 }
 0xcdf   :  { %v1388_v19 = vpop.f32.mrf.mxu0  ;;  %v1350_v27 = vadd.f32 %v1349_v18, %v1286_v21 }
 0xce0   :  { %v1389_v22 = vadd.f32 %v1388_v19, %v1289_v34 }
 0xce2   :  { %v1398_v31 = vrot.slane %v1389_v22, 2 }
 0xce4   :  { %v1362_v23 = vpop.f32.mrf.mxu2 }
 0xce5   :  { %v1363_v24 = vadd.f32 %v1362_v23, %v1287_v8  ;;  %v1375_v25 = vpop.f32.mrf.mxu3 }
 0xce6   :  { %v1376_v26 = vadd.f32 %v1375_v25, %v1288_v20  ;;  %v1351_v58 = vpop.f32.mrf.mxu1 }
 0xce7   :  { %v1396_v29 = vrot.slane %v1363_v24, 6  ;;  %v1390_v30 = vpop.f32.mrf.mxu0 }
 0xce8   :  { %v1397_v32 = vrot.slane %v1376_v26, 4 }
 0xce9   :  { %v1400_v33 = vsel %vm1399_vm3, %v1350_v27, %v1396_v29 }
 0xcea   :  { %v1402_v35 = vsel %vm1401_vm4, %v1397_v32, %v1398_v31 }
 0xceb   :  { %v1404_v37 = vsel %vm1403_vm6, %v1400_v33, %v1402_v35 }
 0xcec   :  { %v1364_v38 = vpop.f32.mrf.mxu2  ;;  %1406 = vst [vmem:[#allocation13] sm:$0xff] %v1404_v37 }
 0xced   :  { %v1377_v40 = vpop.f32.mrf.mxu3 }
 0xcee   :  { %v1437_v42 = vpop.f32.mrf.mxu1 }
 0xcef   :  { %v1438_v45 = vadd.f32 %v2436_v36, %v1437_v42 }
 0xcf1   :  { %v1445_v48 = vmul.f32 %v1444_v43, %v1438_v45 }
 0xcf3   :  { %v1446_v49 = vadd.f32 %v1445_v48, %v1442_v47 }
 0xcf4   :  { %v1468_v52 = vpop.f32.mrf.mxu2 }
 0xcf5   :  { %v1471_v63 = vadd.f32 %v1468_v52, %v1446_v49  ;;  %v1534_v26 = vpop.f32.mrf.mxu3 }
 0xcf7   :  { %2504 = vtanh.f32 %v1471_v63  ;;  %v2280_v1 = vmul.f32 -1.442695, %v1471_v63 }
 0xcf9   :  { %2506 = vpow2.f32 %v2280_v1 }
 0xcfd   :  { %v2505_v0 = vpop.eup %2504 }
 0xcfe   :  { %1494 = vrot.lane.b32.xlu0 %v2505_v0, %s2711_s5 }
 0xcff   :  { %v2507_v3 = vpop.eup %2506 }
 0xd00   :  { %v1475_v61 = vadd.f32 1.0, %v2507_v3 }
 0xd02   :  { %2508 = vrcp.f32 %v1475_v61  ;;  %v1487_v11 = vand.u32 2147483648, %v1475_v61  ;;  %vm1481_vm8 = vweird.f32 %v1475_v61  ;;  %v1485_v15 = vand.u32 2147483647, %v1475_v61 }
 0xd04   :  { %v1488_v17 = vor.u32 1.1754944e-38, %v1487_v11  ;;  %vm1486_vm10 = vcmp.eq.f32.partialorder %v1485_v15, 8.507059e+37  ;;  %v2310_v11 = vld [vmem:[%s3675_s19 + $0x28] sm:$0xf]  ;;  %v2410_v15 = vld [vmem:[%s3675_s19 + $0x34] sm:$0xf0] }
 0xd08   :  { %v2509_v5 = vpop.eup %2508 }
 0xd09   :  { %v1477_v54 = vmul.f32 %v2509_v5, %v1475_v61  ;;  %vm1482_vm7 = vweird.f32 %v2509_v5 }
 0xd0a   :  { %vm1483_vm9 = vmor %vm1481_vm8, %vm1482_vm7 }
 0xd0b   :  { %v1478_v60 = vsub.f32 1.0, %v1477_v54  ;;  %v2302_v54 = vld [vmem:[%s3675_s19 + $0x20] sm:$0xf] }
 0xd0d   :  { %v1479_v62 = vmul.f32 %v2509_v5, %v1478_v60  ;;  %v2407_v60 = vld [vmem:[%s3675_s19 + $0x24] sm:$0xf] }
 0xd0f   :  { %v1480_v10 = vadd.f32 %v2509_v5, %v1479_v62 }
 0xd11   :  { %v1484_v16 = vsel %vm1483_vm9, %v2509_v5, %v1480_v10  ;;  %v2304_v10 = vld [vmem:[%s3675_s19 + $0x30] sm:$0xf0] }
 0xd12   :  { %v1489_v19 = vsel %vm1486_vm10, %v1488_v17, %v1484_v16  ;;  %v2307_v16 = vor.u32 %v2407_v60, %v2304_v10  ;;  %v2311_v17 = vor.u32 %v2410_v15, %v2310_v11 }
 0xd13   :  { %v1492_v8 = vmul.f32 %v1489_v19, %v3306_v44  ;;  %v2437_v44 = vld [vmem:[%s3672_s16] ss:$0 sm:$0xff] }
 0xd14   :  { %1688 = vmatpush.bf16.msra.mxu2 %v2307_v16  ;;  %1701 = vmatpush.bf16.msra.mxu3 %v2311_v17 }
 0xd70   :  { %v1495_v18 = vpop.permute.xlu0 %1494 }
 0xd71   :  { %v1497_v34 = vmul.f32 %v1495_v18, %v1489_v19  ;;  %v2408_v18 = vld [vmem:[%s3675_s19 + $0x2c] sm:$0xf] }
 0xd73   :  { %1499 = vrot.lane.b32.xlu1 %v1497_v34, %s2711_s5  ;;  %v2286_v34 = vld [vmem:[%s3675_s19] sm:$0xf] }
 0xde5   :  { %v1500_v20 = vpop.permute.xlu1 %1499 }
 0xde6   :  { %v3475_v21 = vadd.f32 %v1500_v20, %v1492_v8  ;;  %v2405_v20 = vld [vmem:[%s3675_s19 + $0xc] sm:$0xf0] }
 0xde8   :  { %2510 = vtanh.f32 %v3475_v21 }
 0xdee   :  { %v2511_v22 = vpop.eup %2510 }
 0xdef   :  { %1505 = vrot.lane.b32.xlu2 %v2511_v22, %s2711_s5  ;;  %v2403_v22 = vld [vmem:[%s3675_s19 + $0x4] sm:$0xf] }
 0xe49   :  { %v1506_v23 = vpop.permute.xlu2 %1505 }
 0xe4a   :  { %v1508_v24 = vmul.f32 %v1506_v23, %v1489_v19  ;;  %v2312_v19 = vld [vmem:[%s3675_s19 + $0x38] sm:$0xf0]  ;;  %v2288_v23 = vld [vmem:[%s3675_s19 + $0x10] sm:$0xf0] }
 0xe4b   :  { %v2315_v8 = vor.u32 %v2408_v18, %v2312_v19 }
 0xe4c   :  { %1538 = vrot.lane.b32.xlu0 %v1508_v24, %s2712_s8  ;;  %v2287_v24 = vor.u32 %v2405_v20, %v2286_v34 }
 0xe4d   :  { %1714 = vmatpush.bf16.msrb.mxu0 %v2315_v8 }
 0xebe   :  { %v3480_v25 = vpop.permute.xlu0 %1538 }
 0xebf   :  { %2282 = vmatmul.msk.f32.vlgmr.msra.gmra.mxu0 %vm624_vm5, %v3480_v25 }
 0xf3c   :  { %v1559_v58 = vpop.f32.mrf.mxu0 }
 0xf3d   :  { %v1560_v27 = vadd.f32 %v1559_v58, %v1534_v26  ;;  %v2294_v26 = vld [vmem:[%s3675_s19 + $0x8] sm:$0xf]  ;;  %v2406_v58 = vld [vmem:[%s3675_s19 + $0x14] sm:$0xf0] }
 0xf3f   :  { %v1566_v29 = vadd.f32 %v2437_v44, %v1560_v27  ;;  %v2291_v44 = vor.u32 %v2403_v22, %v2288_v23  ;;  %v2404_v27 = vld [vmem:[%s3675_s19 + $0xc] sm:$0xf]  ;;  %v1826_v23 = vrot.slane %v3475_v21, 6 }
 0xf41   :  { %2512 = vtanh.f32 %v1566_v29  ;;  %v2283_v31 = vmul.f32 -1.442695, %v1566_v29  ;;  %v2295_v29 = vor.u32 %v2406_v58, %v2294_v26  ;;  %1689 = vmatpush.bf16.msra.mxu2 %v2291_v44 }
 0xf43   :  { %2514 = vpow2.f32 %v2283_v31  ;;  %1702 = vmatpush.bf16.msra.mxu3 %v2295_v29 }
 0xf45   :  { %1793 = vmatpush.msrb.mxu2 %v3268_v53 }
 0xf47   :  { %v2513_v30 = vpop.eup %2512  ;;  %1865 = vmatpush.msrb.mxu3 %v3315_v46  ;;  %1794 = vmatpush.msrb.mxu2 %v3273_v55 }
 0xf48   :  { %1589 = vrot.lane.b32.xlu1 %v2513_v30, %s2711_s5  ;;  %v2296_v30 = vld [vmem:[%s3675_s19 + $0x18] sm:$0xf0] }
 0xf49   :  { %v2515_v32 = vpop.eup %2514  ;;  %v2299_v31 = vor.u32 %v2404_v27, %v2296_v30  ;;  %1866 = vmatpush.msrb.mxu3 %v3320_v56  ;;  %1795 = vmatpush.msrb.mxu2 %v3279_v51  ;;  %v1613_v51 = vld [vmem:[%s3676_s20] sm:$0xf] }
 0xf4a   :  { %v1570_v33 = vadd.f32 1.0, %v2515_v32  ;;  %v1618_v56 = vperm.slane %v1613_v51, 3 }
 0xf4b   :  { %1715 = vmatpush.bf16.msrb.mxu0 %v2299_v31  ;;  %1867 = vmatpush.msrb.mxu3 %v3326_v50  ;;  %v1616_v50 = vperm.slane %v1613_v51, 1 }
 0xf4c   :  { %2516 = vrcp.f32 %v1570_v33  ;;  %v1582_v41 = vand.u32 2147483648, %v1570_v33  ;;  %vm1576_vm12 = vweird.f32 %v1570_v33  ;;  %v1580_v42 = vand.u32 2147483647, %v1570_v33  ;;  %1796 = vmatpush.msrb.mxu2 %v3288_v2 }
 0xf4d   :  { %1868 = vmatpush.msrb.mxu3 %v3332_v57  ;;  %v1617_v57 = vperm.slane %v1613_v51, 2 }
 0xf4e   :  { %v1583_v45 = vor.u32 1.1754944e-38, %v1582_v41  ;;  %vm1581_vm14 = vcmp.eq.f32.partialorder %v1580_v42, 8.507059e+37 }
 0xf4f   :  { %1891 = vmatpush.msra.mxu0 %v3341_v4  ;;  %v1615_v4 = vperm.slane %v1613_v51, 0 }
 0xf51   :  { %1892 = vmatpush.msra.mxu0 %v3346_v59 }
 0xf52   :  { %v2517_v35 = vpop.eup %2516 }
 0xf53   :  { %v1572_v36 = vmul.f32 %v2517_v35, %v1570_v33  ;;  %vm1577_vm11 = vweird.f32 %v2517_v35  ;;  %1893 = vmatpush.msra.mxu0 %v3352_v6 }
 0xf54   :  { %vm1578_vm13 = vmor %vm1576_vm12, %vm1577_vm11 }
 0xf55   :  { %v1573_v37 = vsub.f32 1.0, %v1572_v36  ;;  %1894 = vmatpush.msra.mxu0 %v3358_v7 }
 0xf57   :  { %v1574_v38 = vmul.f32 %v2517_v35, %v1573_v37 }
 0xf59   :  { %v1575_v40 = vadd.f32 %v2517_v35, %v1574_v38  ;;  %v2438_v38 = vld [vmem:[%s3674_s18] ss:$0 sm:$0xff] }
 0xf5b   :  { %v1579_v43 = vsel %vm1578_vm13, %v2517_v35, %v1575_v40 }
 0xf5c   :  { %v1584_v48 = vsel %vm1581_vm14, %v1583_v45, %v1579_v43  ;;  %v1771_v45 = vstv %s1770_s13 }
 0xf5d   :  { %v1587_v52 = vmul.f32 %v1584_v48, %v3372_v28  ;;  %v2409_v28 = vld [vmem:[%s3675_s19 + $0x2c] sm:$0xf0] }
 0xf5e   :  { %v2303_v62 = vor.u32 %v2409_v28, %v2302_v54 }
 0xf60   :  { %1675 = vmatpush.bf16.msra.mxu1 %v2303_v62 }
 0xf64   :  { %1676 = vmatpush.bf16.msra.mxu1 %v2287_v24 }
 0xf68   :  { %1759 = vmatpush.msrb.mxu1 %v3438_v12 }
 0xf6a   :  { %1760 = vmatpush.msrb.mxu1 %v3440_v13 }
 0xf6c   :  { %1761 = vmatpush.msrb.mxu1 %v3443_v9 }
 0xf6e   :  { %1762 = vmatpush.msrb.mxu1 %v3446_v14 }
 0xfba   :  { %v1590_v47 = vpop.permute.xlu1 %1589 }
 0xfbb   :  { %v1592_v49 = vmul.f32 %v1590_v47, %v1584_v48 }
 0xfbd   :  { %1594 = vrot.lane.b32.xlu2 %v1592_v49, %s2711_s5 }
0x1017   :  { %v1595_v63 = vpop.permute.xlu2 %1594 }
0x1018   :  { %v3490_v0 = vadd.f32 %v1595_v63, %v1587_v52 }
0x101a   :  { %2518 = vtanh.f32 %v3490_v0 }
0x1020   :  { %v2519_v1 = vpop.eup %2518 }
0x1021   :  { %1600 = vrot.lane.b32.xlu0 %v2519_v1, %s2711_s5 }
0x1093   :  { %v1601_v3 = vpop.permute.xlu0 %1600 }
0x1094   :  { %v1603_v61 = vmul.f32 %v1601_v3, %v1584_v48  ;;  %v1768_v48 = vstv %s2321_s12 }
0x1095   :  { %v1769_v52 = vmul.f32 %v1768_v48, %v3469_v39  ;;  %v2417_v48 = vld [vmem:[%s3675_s19 + $0x2c] sm:$0xf0] }
0x1096   :  { %v1604_v5 = vpack.c.bf16 %v1603_v61, %v1603_v61  ;;  %1743 = vrot.lane.b32.xlu2 %v1603_v61, %s2712_s8 }
0x1098   :  { %1624 = vrot.lane.b32.xlu1 %v1604_v5, %s2712_s8 }
0x10f0   :  { %v1744_v55 = vpop.permute.xlu2 %1743 }
0x110a   :  { %v1625_v53 = vpop.permute.xlu1 %1624 }
0x110b   :  { %2316 = vmatmul.msk.bf16.vlgmr.msra.gmra.mxu1 %vm624_vm5, %v1625_v53  ;;  %2317 = vmatmul.msk.bf16.vlgmr.msra.gmra.mxu2 %vm624_vm5, %v1625_v53 }
0x110c   :  { %2318 = vmatmul.msk.bf16.vlgmr.msra.gmra.mxu3 %vm624_vm5, %v1625_v53  ;;  %2319 = vmatmul.msk.bf16.vlgmr.msrb.gmra.mxu0 %vm624_vm5, %v1625_v53  ;;  %v2439_v53 = vld [vmem:[%s3672_s16] ss:$0 sm:$0xff] }
0x111b   :  { %2320 = vmatmul.msk.f32.vlgmr.msrb.gmra.mxu1 %vm624_vm5, %v1744_v55  ;;  %2322 = vmatmul.msk.f32.vlgmr.msrb.gmra.mxu2 %vm624_vm5, %v3480_v25 }
0x111c   :  { %2324 = vmatmul.msk.f32.vlgmr.msrb.gmra.mxu3 %vm624_vm5, %v1744_v55 }
0x1188   :  { %v1678_v2 = vpop.f32.mrf.mxu1 }
0x1189   :  { %v1717_v46 = vpop.f32.mrf.mxu0  ;;  %v1679_v14 = vadd.f32 %v1678_v2, %v1615_v4 }
0x118a   :  { %v1718_v59 = vadd.f32 %v1717_v46, %v1618_v56 }
0x118c   :  { %v1727_v33 = vrot.slane %v1718_v59, 2 }
0x118e   :  { %v1691_v6 = vpop.f32.mrf.mxu2 }
0x118f   :  { %v1692_v7 = vadd.f32 %v1691_v6, %v1616_v50  ;;  %v1704_v12 = vpop.f32.mrf.mxu3 }
0x1190   :  { %v1705_v13 = vadd.f32 %v1704_v12, %v1617_v57  ;;  %v1680_v9 = vpop.f32.mrf.mxu1 }
0x1191   :  { %v1725_v25 = vrot.slane %v1692_v7, 6  ;;  %v1719_v32 = vpop.f32.mrf.mxu0 }
0x1192   :  { %v1726_v35 = vrot.slane %v1705_v13, 4 }
0x1193   :  { %v1728_v36 = vsel %vm1399_vm3, %v1679_v14, %v1725_v25 }
0x1194   :  { %v1729_v37 = vsel %vm1401_vm4, %v1726_v35, %v1727_v33 }
0x1195   :  { %v1730_v40 = vsel %vm1403_vm6, %v1728_v36, %v1729_v37 }
0x1196   :  { %v1693_v41 = vpop.f32.mrf.mxu2  ;;  %1733 = vst [vmem:[#allocation13 + $0x8] sm:$0xff] %v1730_v40 }
0x1197   :  { %v1706_v42 = vpop.f32.mrf.mxu3  ;;  %v2415_v41 = vld [vmem:[%s3675_s19 + $0x24] sm:$0xf] }
0x1198   :  { %v1764_v43 = vpop.f32.mrf.mxu1  ;;  %v2347_v42 = vld [vmem:[%s3675_s19 + $0x30] sm:$0xf0] }
0x1199   :  { %v1765_v47 = vadd.f32 %v2438_v38, %v1764_v43  ;;  %v2353_v43 = vld [vmem:[%s3675_s19 + $0x28] sm:$0xf] }
0x119b   :  { %v1772_v49 = vmul.f32 %v1771_v45, %v1765_v47  ;;  %v2350_v45 = vor.u32 %v2415_v41, %v2347_v42  ;;  %v2345_v47 = vld [vmem:[%s3675_s19 + $0x20] sm:$0xf] }
0x119d   :  { %v1774_v63 = vrot.slane %v1772_v49, 6  ;;  %2025 = vmatpush.bf16.msra.mxu2 %v2350_v45 }
0x119e   :  { %v1798_v1 = vpop.f32.mrf.mxu2 }
0x119f   :  { %v1776_v3 = vadd.f32 %v1774_v63, %v1769_v52  ;;  %v1802_v61 = vrot.slane %v1798_v1, 6  ;;  %v1870_v21 = vpop.f32.mrf.mxu3  ;;  %v2346_v52 = vor.u32 %v2417_v48, %v2345_v47  ;;  %v2416_v63 = vld [vmem:[%s3675_s19 + $0x2c] sm:$0xf]  ;;  %v2355_v1 = vld [vmem:[%s3675_s19 + $0x38] sm:$0xf0] }
0x11a1   :  { %v1804_v5 = vadd.f32 %v1802_v61, %v1776_v3  ;;  %v2411_v3 = vld [vmem:[%s3675_s19 + $0x4] sm:$0xf]  ;;  %v2358_v61 = vor.u32 %v2416_v63, %v2355_v1  ;;  %2012 = vmatpush.bf16.msra.mxu1 %v2346_v52 }
0x11a3   :  { %2520 = vtanh.f32 %v1804_v5  ;;  %v2323_v28 = vmul.f32 -1.442695, %v1804_v5  ;;  %v2331_v5 = vld [vmem:[%s3675_s19 + $0x10] sm:$0xf0]  ;;  %2051 = vmatpush.bf16.msrb.mxu0 %v2358_v61 }
0x11a5   :  { %2522 = vpow2.f32 %v2323_v28  ;;  %v2414_v28 = vld [vmem:[%s3675_s19 + $0x14] sm:$0xf0] }
0x11a9   :  { %v2521_v54 = vpop.eup %2520 }
0x11aa   :  { %1830 = vrot.lane.b32.xlu0 %v2521_v54, %s2711_s5  ;;  %v2337_v54 = vld [vmem:[%s3675_s19 + $0x8] sm:$0xf] }
0x11ab   :  { %v2523_v60 = vpop.eup %2522 }
0x11ac   :  { %v1808_v62 = vadd.f32 1.0, %v2523_v60  ;;  %v2334_v60 = vor.u32 %v2411_v3, %v2331_v5 }
0x11ae   :  { %2524 = vrcp.f32 %v1808_v62  ;;  %v1820_v39 = vand.u32 2147483648, %v1808_v62  ;;  %vm1814_vm0 = vweird.f32 %v1808_v62  ;;  %v1818_v18 = vand.u32 2147483647, %v1808_v62  ;;  %2026 = vmatpush.bf16.msra.mxu2 %v2334_v60 }
0x11b0   :  { %v1821_v34 = vor.u32 1.1754944e-38, %v1820_v39  ;;  %vm1819_vm2 = vcmp.eq.f32.partialorder %v1818_v18, 8.507059e+37 }
0x11b4   :  { %v2525_v10 = vpop.eup %2524 }
0x11b5   :  { %v1810_v11 = vmul.f32 %v2525_v10, %v1808_v62  ;;  %vm1815_vm15 = vweird.f32 %v2525_v10  ;;  %v2338_v62 = vor.u32 %v2414_v28, %v2337_v54 }
0x11b6   :  { %vm1816_vm1 = vmor %vm1814_vm0, %vm1815_vm15 }
0x11b7   :  { %v1811_v15 = vsub.f32 1.0, %v1810_v11  ;;  %v2413_v11 = vld [vmem:[%s3675_s19 + $0xc] sm:$0xf0] }
0x11b9   :  { %v1812_v16 = vmul.f32 %v2525_v10, %v1811_v15  ;;  %v2412_v15 = vld [vmem:[%s3675_s19 + $0xc] sm:$0xf] }
0x11bb   :  { %v1813_v17 = vadd.f32 %v2525_v10, %v1812_v16 }
0x11bd   :  { %v1817_v19 = vsel %vm1816_vm1, %v2525_v10, %v1813_v17  ;;  %v2329_v10 = vld [vmem:[%s3675_s19] sm:$0xf]  ;;  %v2339_v17 = vld [vmem:[%s3675_s19 + $0x18] sm:$0xf0] }
0x11be   :  { %v1822_v20 = vsel %vm1819_vm2, %v1821_v34, %v1817_v19  ;;  %v2330_v16 = vor.u32 %v2413_v11, %v2329_v10  ;;  %v2342_v39 = vor.u32 %v2412_v15, %v2339_v17 }
0x11bf   :  { %v1828_v24 = vmul.f32 %v1826_v23, %v1822_v20 }
0x11c0   :  { %2013 = vmatpush.bf16.msra.mxu1 %v2330_v16  ;;  %2052 = vmatpush.bf16.msrb.mxu0 %v2342_v39 }
0x121c   :  { %v1831_v8 = vpop.permute.xlu0 %1830 }
0x121d   :  { %v1833_v22 = vmul.f32 %v1831_v8, %v1822_v20 }
0x121f   :  { %1835 = vrot.lane.b32.xlu1 %v1833_v22, %s2711_s5 }
0x1291   :  { %v1836_v44 = vpop.permute.xlu1 %1835 }
0x1292   :  { %v1838_v26 = vadd.f32 %v1836_v44, %v1828_v24 }
0x1294   :  { %2526 = vtanh.f32 %v1838_v26 }
0x129a   :  { %v2527_v58 = vpop.eup %2526 }
0x129b   :  { %1841 = vrot.lane.b32.xlu2 %v2527_v58, %s2711_s5 }
0x12f5   :  { %v1842_v27 = vpop.permute.xlu2 %1841 }
0x12f6   :  { %v1844_v29 = vmul.f32 %v1842_v27, %v1822_v20  ;;  %v1950_v20 = vld [vmem:[%s3676_s20] sm:$0xf]  ;;  %s3693_s20 = sld [smem:[#allocation25_spill]] }
0x12f7   :  { %v1955_v24 = vperm.slane %v1950_v20, 3  ;;  %v1953_v44 = vperm.slane %v1950_v20, 1  ;;  %v1954_v26 = vperm.slane %v1950_v20, 2  ;;  %v1952_v58 = vperm.slane %v1950_v20, 0 }
0x12f8   :  { %v1874_v30 = vrot.slane %v1844_v29, 2 }
0x12fa   :  { %1875 = vrot.lane.b32.xlu0 %v1874_v30, %s2712_s8 }
0x136c   :  { %v1876_v31 = vpop.permute.xlu0 %1875 }
0x136d   :  { %2325 = vmatmul.msk.f32.vlgmr.msra.gmra.mxu0 %vm624_vm5, %v1876_v31 }
0x13ea   :  { %v1896_v55 = vpop.f32.mrf.mxu0 }
0x13eb   :  { %v1897_v51 = vadd.f32 %v1896_v55, %v1870_v21 }
0x13ed   :  { %v1903_v2 = vadd.f32 %v2439_v53, %v1897_v51 }
0x13ef   :  { %2528 = vtanh.f32 %v1903_v2  ;;  %v2326_v56 = vmul.f32 -1.442695, %v1903_v2 }
0x13f1   :  { %2530 = vpow2.f32 %v2326_v56 }
0x13f5   :  { %v2529_v46 = vpop.eup %2528 }
0x13f6   :  { %1926 = vrot.lane.b32.xlu1 %v2529_v46, %s2711_s5 }
0x13f7   :  { %v2531_v50 = vpop.eup %2530 }
0x13f8   :  { %v1907_v57 = vadd.f32 1.0, %v2531_v50 }
0x13fa   :  { %2532 = vrcp.f32 %v1907_v57  ;;  %v1919_v13 = vand.u32 2147483648, %v1907_v57  ;;  %vm1913_vm8 = vweird.f32 %v1907_v57  ;;  %v1917_v9 = vand.u32 2147483647, %v1907_v57 }
0x13fc   :  { %v1920_v25 = vor.u32 1.1754944e-38, %v1919_v13  ;;  %vm1918_vm10 = vcmp.eq.f32.partialorder %v1917_v9, 8.507059e+37 }
0x1400   :  { %v2533_v4 = vpop.eup %2532 }
0x1401   :  { %v1909_v59 = vmul.f32 %v2533_v4, %v1907_v57  ;;  %vm1914_vm7 = vweird.f32 %v2533_v4 }
0x1402   :  { %vm1915_vm9 = vmor %vm1913_vm8, %vm1914_vm7 }
0x1403   :  { %v1910_v6 = vsub.f32 1.0, %v1909_v59 }
0x1405   :  { %v1911_v7 = vmul.f32 %v2533_v4, %v1910_v6 }
0x1407   :  { %v1912_v12 = vadd.f32 %v2533_v4, %v1911_v7 }
0x1409   :  { %v1916_v14 = vsel %vm1915_vm9, %v2533_v4, %v1912_v12 }
0x140a   :  { %v1921_v33 = vsel %vm1918_vm10, %v1920_v25, %v1916_v14 }
0x140b   :  { %v1924_v36 = vmul.f32 %v1921_v33, %v3490_v0  ;;  %v2418_v0 = vld [vmem:[%s3675_s19 + $0x34] sm:$0xf0] }
0x140c   :  { %v2354_v49 = vor.u32 %v2418_v0, %v2353_v43 }
0x140e   :  { %2038 = vmatpush.bf16.msra.mxu3 %v2354_v49 }
0x1412   :  { %2039 = vmatpush.bf16.msra.mxu3 %v2338_v62 }
0x1468   :  { %v1927_v32 = vpop.permute.xlu1 %1926 }
0x1469   :  { %v1929_v35 = vmul.f32 %v1927_v32, %v1921_v33 }
0x146b   :  { %1931 = vrot.lane.b32.xlu2 %v1929_v35, %s2711_s5 }
0x14c5   :  { %v1932_v37 = vpop.permute.xlu2 %1931 }
0x14c6   :  { %v1934_v38 = vadd.f32 %v1932_v37, %v1924_v36 }
0x14c8   :  { %2534 = vtanh.f32 %v1934_v38 }
0x14ce   :  { %v2535_v40 = vpop.eup %2534 }
0x14cf   :  { %1937 = vrot.lane.b32.xlu0 %v2535_v40, %s2711_s5  ;;  %s2077_s5 = sshll.u32 %s3693_s20, 4  ;;  %s2078_s5 = int_to_ptr.hbm [resolvable:$true] %s2077_s5 }
0x1541   :  { %v1938_v18 = vpop.permute.xlu0 %1937 }
0x1542   :  { %v1940_v19 = vmul.f32 %v1938_v18, %v1921_v33 }
0x1544   :  { %v1941_v34 = vpack.c.bf16 %v1940_v19, %v1940_v19 }
0x1546   :  { %1961 = vrot.lane.b32.xlu1 %v1941_v34, %s2712_s8  ;;  %s2713_s8 = smov [#allocation13]  }
0x1547   :  { %s2075_s15 = sshll.u32 %s2713_s8, 4  ;;  %s2076_s15 = int_to_ptr.vmem [resolvable:$true] %s2075_s15 }
0x15b8   :  { %v1962_v8 = vpop.permute.xlu1 %1961 }
0x15b9   :  { %2359 = vmatmul.msk.bf16.vlgmr.msra.gmra.mxu1 %vm624_vm5, %v1962_v8  ;;  %2360 = vmatmul.msk.bf16.vlgmr.msra.gmra.mxu2 %vm624_vm5, %v1962_v8 }
0x15ba   :  { %2361 = vmatmul.msk.bf16.vlgmr.msra.gmra.mxu3 %vm624_vm5, %v1962_v8  ;;  %2362 = vmatmul.msk.bf16.vlgmr.msrb.gmra.mxu0 %vm624_vm5, %v1962_v8 }
0x1636   :  { %v2015_v22 = vpop.f32.mrf.mxu1 }
0x1637   :  { %v2054_v23 = vpop.f32.mrf.mxu0  ;;  %v2016_v55 = vadd.f32 %v2015_v22, %v1952_v58 }
0x1638   :  { %v2055_v27 = vadd.f32 %v2054_v23, %v1955_v24 }
0x163a   :  { %v2064_v46 = vrot.slane %v2055_v27, 2 }
0x163c   :  { %v2028_v29 = vpop.f32.mrf.mxu2 }
0x163d   :  { %v2029_v30 = vadd.f32 %v2028_v29, %v1953_v44  ;;  %v2041_v31 = vpop.f32.mrf.mxu3 }
0x163e   :  { %v2042_v53 = vadd.f32 %v2041_v31, %v1954_v26  ;;  %v2017_v21 = vpop.f32.mrf.mxu1 }
0x163f   :  { %v2062_v51 = vrot.slane %v2029_v30, 6  ;;  %v2056_v2 = vpop.f32.mrf.mxu0 }
0x1640   :  { %v2063_v56 = vrot.slane %v2042_v53, 4 }
0x1641   :  { %v2065_v50 = vsel %vm1399_vm3, %v2016_v55, %v2062_v51 }
0x1642   :  { %v2066_v57 = vsel %vm1401_vm4, %v2063_v56, %v2064_v46 }
0x1643   :  { %v2067_v4 = vsel %vm1403_vm6, %v2065_v50, %v2066_v57 }
0x1644   :  { %v2030_v59 = vpop.f32.mrf.mxu2  ;;  %2070 = vst [vmem:[#allocation13 + $0x10] sm:$0xff] %v2067_v4 }
0x1645   :  { %v2043_v6 = vpop.f32.mrf.mxu3  ;;  %2083 = dma.vmem_to_hbm [thread:$0]  %s2076_s15, 384, %s2078_s5, [#allocation4], %s2708_s2, %s2708_s2, %s2709_s25  }
0x1646   :  { %2700 = dma.done.wait [#allocation4], 384  }
0x1647   :  { %2701 = vsyncadd [#allocation4], 4294966912 }
0x1648   :  { %2088 = vsyncpa [#allocation3], 1 }
0x1649   :  { %2089 = vsyncpa [#allocation8], 1 }
0x164a   :  { %2090 = vsyncpa [#allocation11], 1 }
0x164b   :  { %2091 = vsyncpa [#allocation4], 1 }
0x164c   :  { %2092 = vsyncpa [#allocation5], 1 }

</bundles_post_ra>
